<compile_context>
chip_gen: v5e
topology: v5e:2x2
jax: 0.10.0
libtpu: 0.0.40
codegen_flags: <defaults>
</compile_context>

<pallas_src>
import functools

import numpy as np
import jax
import jax.numpy as jnp
from jax import lax
from jax.experimental import pallas as pl
from jax.experimental.pallas import tpu as pltpu


def _round_up(x, m):
    return ((x + m - 1) // m) * m


def hawkes_kernel(src_ref, tgt_ref, t_ref, bias_ref, pred_ref, h_ref, *,
                  inv_log_time_log):
    """One batch tile.

    src_ref/tgt_ref : (2, Bt, Lp, E) bf16 -- [alpha, beta] stacked on axis 0
    t_ref, bias_ref : (Bt, 1, Lp) f32     -- times already in seconds
    pred_ref, h_ref : (Bt, 1, Lp) f32
    """
    _, Bt, Lp, E = src_ref.shape

    # ---- fused batched matmuls: alphas & betas in one MXU einsum ---------
    src = src_ref[...].reshape(2 * Bt, Lp, E)      # leading-dim collapse: free
    tgt = tgt_ref[...].reshape(2 * Bt, Lp, E)
    ab = jnp.einsum('bie,bje->bij', src, tgt,
                    preferred_element_type=jnp.float32)     # (2*Bt, Lp, Lp) f32
    alphas = ab[:Bt]                                         # (Bt, Lp, Lp)
    betas = jnp.clip(ab[Bt:] + 1.0, 0.0, 10.0)               # (Bt, Lp, Lp)

    # ---- pairwise log time deltas (EUP-bound stage) ----------------------
    # TODO(synk): PyTorch computes delta_t / cross_effects in float64; TPU has
    # no fp64 path, so this kernel uses float32 throughout.
    times = t_ref[:, 0, :]                                   # (Bt, Lp) seconds
    delta = jnp.abs(times[:, :, None] - times[:, None, :])   # (Bt, Lp, Lp)
    delta = jnp.log(delta + 1e-10) * inv_log_time_log

    # Clamp the exponent so fp32 stays finite where the fp64 reference would
    # be huge-but-finite (sub-millisecond gaps / zero-padded rows).
    expo = jnp.minimum(-betas * delta, 85.0)
    cross = alphas * jnp.exp(expo)                           # (Bt, Lp, Lp)

    # Strictly-upper-triangular keep (i < j), then reduce over the row axis i.
    # Keep this a select (where), NOT a multiply: masked positions may be huge.
    row = lax.broadcasted_iota(jnp.int32, (Lp, Lp), 0)
    col = lax.broadcasted_iota(jnp.int32, (Lp, Lp), 1)
    keep = (row < col)[None, :, :]
    sum_t = jnp.sum(jnp.where(keep, cross, 0.0), axis=1)     # (Bt, Lp)

    h = bias_ref[:, 0, :] + sum_t
    h_ref[...] = h[:, None, :]
    pred_ref[...] = jax.nn.sigmoid(h)[:, None, :]


def _choose_batch_tile(B, Lp, E):
    """Largest batch tile whose VMEM footprint stays under ~36 MiB.

    Rough per-batch-element bytes: ~4 live (Lp,Lp) f32 temporaries (fused
    matmul out x2 + delta/cross), plus double-buffered bf16 embeddings and
    f32 vectors. 36 MiB leaves headroom under v7x's 64 MiB physical VMEM.
    """
    per_b = 4 * Lp * Lp * 4
    per_b += 2 * (2 * 2 * Lp * E * 2 + 4 * Lp * 4)
    budget = 36 * 1024 * 1024
    bt = int(max(1, budget // per_b))
    bt = min(B, bt)
    n_tiles = -(-B // bt)
    return -(-B // n_tiles)          # even out tiles (avoid mostly-padded tail)


def init_params(key, n_skills, n_problems, emb_size):
    ks = jax.random.split(key, 6)
    std = 0.01
    return {
        'problem_base': std * jax.random.normal(ks[0], (n_problems, 1), jnp.float32),
        'skill_base':   std * jax.random.normal(ks[1], (n_skills, 1), jnp.float32),
        'alpha_inter':  std * jax.random.normal(ks[2], (2 * n_skills, emb_size), jnp.float32),
        'alpha_skill':  std * jax.random.normal(ks[3], (n_skills, emb_size), jnp.float32),
        'beta_inter':   std * jax.random.normal(ks[4], (2 * n_skills, emb_size), jnp.float32),
        'beta_skill':   std * jax.random.normal(ks[5], (n_skills, emb_size), jnp.float32),
    }


def hawkes_forward(params, skills, problems, times, labels, *, n_skills,
                   time_log, qtest=False):
    # --- plain-JAX glue: embedding gathers (no clean Pallas gather) -------
    inters = skills + labels * n_skills                              # (B, L)
    a_src = jnp.take(params['alpha_inter'], inters, axis=0)          # (B, L, E)
    a_tgt = jnp.take(params['alpha_skill'], skills, axis=0)
    b_src = jnp.take(params['beta_inter'], inters, axis=0)
    b_tgt = jnp.take(params['beta_skill'], skills, axis=0)
    problem_bias = jnp.take(params['problem_base'], problems, axis=0)[..., 0]
    skill_bias = jnp.take(params['skill_base'], skills, axis=0)[..., 0]
    bias = problem_bias + skill_bias                                 # (B, L)

    B, L, E = a_src.shape

    # Seconds, with a per-sequence baseline subtracted to reduce fp32
    # cancellation in t_i - t_j (|t_i - t_j| is invariant to the shift).
    tf = times.astype(jnp.float32)
    times_f = (tf - tf[:, :1]) / 1000.0

    # --- lane-dense padding & batch tiling --------------------------------
    Lp = max(128, _round_up(L, 128))
    Bt = _choose_batch_tile(B, Lp, E)
    Bp = _round_up(B, Bt)

    def pad_bl(x):  # (B, L, ...) -> (Bp, Lp, ...)  zero-padded
        widths = [(0, Bp - B), (0, Lp - L)] + [(0, 0)] * (x.ndim - 2)
        return jnp.pad(x, widths)

    # Stack [alpha, beta] so both matmuls run as one fused batched einsum;
    # bf16 is the native MXU dtype (f32 accumulation in-kernel).
    src = jnp.stack([pad_bl(a_src), pad_bl(b_src)], axis=0).astype(jnp.bfloat16)
    tgt = jnp.stack([pad_bl(a_tgt), pad_bl(b_tgt)], axis=0).astype(jnp.bfloat16)
    times_p = pad_bl(times_f)[:, None, :]                  # (Bp, 1, Lp)
    bias_p = pad_bl(bias)[:, None, :]                      # (Bp, 1, Lp)

    emb_spec = pl.BlockSpec((2, Bt, Lp, E), lambda b: (0, b, 0, 0))
    vec_spec = pl.BlockSpec((Bt, 1, Lp), lambda b: (b, 0, 0))

    kernel = functools.partial(
        hawkes_kernel, inv_log_time_log=float(1.0 / np.log(time_log)))

    pred_p, h_p = pl.pallas_call(
        kernel,
        grid=(Bp // Bt,),
        in_specs=[emb_spec, emb_spec, vec_spec, vec_spec],
        out_specs=(vec_spec, vec_spec),
        out_shape=(jax.ShapeDtypeStruct((Bp, 1, Lp), jnp.float32),
                   jax.ShapeDtypeStruct((Bp, 1, Lp), jnp.float32)),
        compiler_params=pltpu.CompilerParams(
            dimension_semantics=("parallel",),          # v7x: 2 TCs share grid
            vmem_limit_bytes=50 * 1024 * 1024),
    )(src, tgt, times_p, bias_p)

    pred = pred_p[:B, 0, :L]
    h = h_p[:B, 0, :L]
    if qtest:
        return pred, h
    return pred


def hawkes_forward_ref(params, skills, problems, times, labels, *, n_skills,
                       time_log, matmul_dtype=jnp.float32):
    # Pure-JAX reference mirroring the PyTorch forward (float32 elementwise;
    # matmul_dtype lets us match the kernel's intentional bf16 matmul).
    inters = skills + labels * n_skills
    a_src = jnp.take(params['alpha_inter'], inters, axis=0).astype(matmul_dtype)
    a_tgt = jnp.take(params['alpha_skill'], skills, axis=0).astype(matmul_dtype)
    b_src = jnp.take(params['beta_inter'], inters, axis=0).astype(matmul_dtype)
    b_tgt = jnp.take(params['beta_skill'], skills, axis=0).astype(matmul_dtype)
    alphas = jnp.einsum('bie,bje->bij', a_src, a_tgt,
                        preferred_element_type=jnp.float32)
    betas = jnp.einsum('bie,bje->bij', b_src, b_tgt,
                       preferred_element_type=jnp.float32)
    t = times.astype(jnp.float32) / 1000.0
    delta_t = jnp.abs(t[:, :, None] - t[:, None, :])
    delta_t = jnp.log(delta_t + 1e-10) / np.float32(np.log(time_log))
    betas = jnp.clip(betas + 1.0, 0.0, 10.0)
    cross = alphas * jnp.exp(-betas * delta_t)
    L = skills.shape[1]
    keep = np.triu(np.ones((1, L, L), dtype=np.float32), k=1) != 0
    sum_t = jnp.sum(jnp.where(keep, cross, 0.0), axis=1)
    pb = jnp.take(params['problem_base'], problems, axis=0)[..., 0]
    sb = jnp.take(params['skill_base'], skills, axis=0)[..., 0]
    h = pb + sb + sum_t
    return jax.nn.sigmoid(h)


if __name__ == "__main__":
    def run_case(key, B, L, n_skills, n_problems, emb_size, time_log):
        kp, ks, kq, kl, kt = jax.random.split(key, 5)
        params = init_params(kp, n_skills, n_problems, emb_size)
        skills = jax.random.randint(ks, (B, L), 0, n_skills, dtype=jnp.int32)
        problems = jax.random.randint(kq, (B, L), 0, n_problems, dtype=jnp.int32)
        labels = jax.random.randint(kl, (B, L), 0, 2, dtype=jnp.int32)
        # monotonically increasing millisecond timestamps
        steps = jax.random.randint(kt, (B, L), 100, 5000, dtype=jnp.int32)
        times = jnp.cumsum(steps, axis=1).astype(jnp.float32)

        pred, h = hawkes_forward(params, skills, problems, times, labels,
                                 n_skills=n_skills, time_log=time_log,
                                 qtest=True)
        pred, h = jax.block_until_ready((pred, h))

        # Tight check vs a reference that matches the kernel's intentional
        # bf16 matmul quantization (validates tiling / padding / masking).
        ref_bf16 = hawkes_forward_ref(params, skills, problems, times, labels,
                                      n_skills=n_skills, time_log=time_log,
                                      matmul_dtype=jnp.bfloat16)
        np.testing.assert_allclose(np.asarray(pred), np.asarray(ref_bf16),
                                   rtol=5e-4, atol=5e-4)
        # Loose check vs the full-f32 reference (bf16 matmul is the only delta).
        ref_f32 = hawkes_forward_ref(params, skills, problems, times, labels,
                                     n_skills=n_skills, time_log=time_log)
        np.testing.assert_allclose(np.asarray(pred), np.asarray(ref_f32),
                                   rtol=1e-2, atol=1e-2)

    key = jax.random.PRNGKey(0)
    k1, k2 = jax.random.split(key)
    # small sanity shape + a shape that exercises L-padding (200 -> 256)
    run_case(k1, B=2, L=8, n_skills=16, n_problems=32, emb_size=32,
             time_log=float(np.e))
    run_case(k2, B=4, L=200, n_skills=64, n_problems=128, emb_size=32,
             time_log=2.0)

    print("KERNEL_OK")
</pallas_src>

<mosaic_0001>
module attributes {stable_mosaic.version = 11 : i64} {
  func.func @hawkes_kernel(%arg0: i32, %arg1: memref<2x2x128x32xbf16, #tpu.memory_space<vmem>>, %arg2: memref<2x2x128x32xbf16, #tpu.memory_space<vmem>>, %arg3: memref<2x1x128xf32, #tpu.memory_space<vmem>>, %arg4: memref<2x1x128xf32, #tpu.memory_space<vmem>>, %arg5: memref<2x1x128xf32, #tpu.memory_space<vmem>>, %arg6: memref<2x1x128xf32, #tpu.memory_space<vmem>>) attributes {dimension_semantics = [#tpu.dimension_semantics<parallel>], iteration_bounds = array<i64: 1>, scalar_prefetch = 0 : i64, scratch_operands = 0 : i64, tpu.core_type = #tpu.core_type<tc>, window_params = [{transform_indices = @transform_0, window_bounds = array<i64: 2, 2, 128, 32>}, {transform_indices = @transform_1, window_bounds = array<i64: 2, 2, 128, 32>}, {transform_indices = @transform_2, window_bounds = array<i64: 2, 1, 128>}, {transform_indices = @transform_3, window_bounds = array<i64: 2, 1, 128>}, {transform_indices = @transform_4, window_bounds = array<i64: 2, 1, 128>}, {transform_indices = @transform_5, window_bounds = array<i64: 2, 1, 128>}]} {
    %c0 = arith.constant 0 : index
    %c0_0 = arith.constant 0 : index
    %c0_1 = arith.constant 0 : index
    %c0_2 = arith.constant 0 : index
    %0 = vector.load %arg1[%c0, %c0_0, %c0_1, %c0_2] : memref<2x2x128x32xbf16, #tpu.memory_space<vmem>>, vector<2x2x128x32xbf16>
    %1 = vector.shape_cast %0 : vector<2x2x128x32xbf16> to vector<4x128x32xbf16>
    %c0_3 = arith.constant 0 : index
    %c0_4 = arith.constant 0 : index
    %c0_5 = arith.constant 0 : index
    %c0_6 = arith.constant 0 : index
    %2 = vector.load %arg2[%c0_3, %c0_4, %c0_5, %c0_6] : memref<2x2x128x32xbf16, #tpu.memory_space<vmem>>, vector<2x2x128x32xbf16>
    %3 = vector.shape_cast %2 : vector<2x2x128x32xbf16> to vector<4x128x32xbf16>
    "tpu.trace_start"() <{level = 10 : i32, message = "bie,bje->bij"}> : () -> ()
    %cst = arith.constant dense<0.000000e+00> : vector<4x128x128xf32>
    %4 = tpu.matmul %1, %3, %cst {dimension_numbers = #tpu.dot_dimension_numbers<[2], [2], [1], [1], [0, 0, 0, 1, 1, 1], [0], [0]>} : vector<4x128x32xbf16>, vector<4x128x32xbf16>, vector<4x128x128xf32> -> vector<4x128x128xf32>
    "tpu.trace_stop"() : () -> ()
    %5 = vector.extract_strided_slice %4 {offsets = [0, 0, 0], sizes = [2, 128, 128], strides = [1, 1, 1]} : vector<4x128x128xf32> to vector<2x128x128xf32>
    %6 = vector.extract_strided_slice %4 {offsets = [2, 0, 0], sizes = [2, 128, 128], strides = [1, 1, 1]} : vector<4x128x128xf32> to vector<2x128x128xf32>
    %cst_7 = arith.constant 1.000000e+00 : f32
    %7 = vector.broadcast %cst_7 : f32 to vector<2x128x128xf32>
    %8 = arith.addf %6, %7 : vector<2x128x128xf32>
    %cst_8 = arith.constant 0.000000e+00 : f32
    %cst_9 = arith.constant 1.000000e+01 : f32
    %9 = vector.broadcast %cst_8 : f32 to vector<2x128x128xf32>
    %10 = arith.maximumf %9, %8 : vector<2x128x128xf32>
    %11 = vector.broadcast %cst_9 : f32 to vector<2x128x128xf32>
    %12 = arith.minimumf %11, %10 : vector<2x128x128xf32>
    %c0_10 = arith.constant 0 : index
    %c0_11 = arith.constant 0 : index
    %c0_12 = arith.constant 0 : index
    %13 = vector.load %arg3[%c0_10, %c0_11, %c0_12] : memref<2x1x128xf32, #tpu.memory_space<vmem>>, vector<2x1x128xf32>
    %14 = vector.shape_cast %13 : vector<2x1x128xf32> to vector<2x128xf32>
    %15 = vector.shape_cast %14 : vector<2x128xf32> to vector<2x128x1xf32>
    %16 = vector.shape_cast %14 : vector<2x128xf32> to vector<2x1x128xf32>
    %17 = vector.broadcast %15 : vector<2x128x1xf32> to vector<2x128x128xf32>
    %18 = vector.broadcast %16 : vector<2x1x128xf32> to vector<2x128x128xf32>
    %19 = arith.subf %17, %18 : vector<2x128x128xf32>
    %20 = math.absf %19 : vector<2x128x128xf32>
    %cst_13 = arith.constant 1.000000e-10 : f32
    %21 = vector.broadcast %cst_13 : f32 to vector<2x128x128xf32>
    %22 = arith.addf %20, %21 : vector<2x128x128xf32>
    %23 = math.log %22 : vector<2x128x128xf32>
    %cst_14 = arith.constant 1.000000e+00 : f32
    %24 = vector.broadcast %cst_14 : f32 to vector<2x128x128xf32>
    %25 = arith.mulf %23, %24 : vector<2x128x128xf32>
    %cst_15 = arith.constant 0.000000e+00 : f32
    %26 = vector.broadcast %cst_15 : f32 to vector<2x128x128xf32>
    %27 = arith.subf %26, %12 : vector<2x128x128xf32>
    %28 = arith.mulf %27, %25 : vector<2x128x128xf32>
    %cst_16 = arith.constant 8.500000e+01 : f32
    %29 = vector.broadcast %cst_16 : f32 to vector<2x128x128xf32>
    %30 = arith.minimumf %28, %29 : vector<2x128x128xf32>
    %31 = math.exp %30 : vector<2x128x128xf32>
    %32 = arith.mulf %5, %31 : vector<2x128x128xf32>
    %33 = tpu.iota {dimensions = array<i32: 0>} : vector<128x128xi32>
    %34 = tpu.iota {dimensions = array<i32: 1>} : vector<128x128xi32>
    %35 = arith.cmpi slt, %33, %34 : vector<128x128xi32>
    %36 = vector.shape_cast %35 : vector<128x128xi1> to vector<1x128x128xi1>
    %cst_17 = arith.constant 0.000000e+00 : f32
    %37 = vector.shape_cast %36 : vector<1x128x128xi1> to vector<1x128x128xi1>
    %38 = vector.broadcast %37 : vector<1x128x128xi1> to vector<2x128x128xi1>
    %39 = vector.broadcast %cst_17 : f32 to vector<2x128x128xf32>
    %40 = arith.select %38, %32, %39 : vector<2x128x128xi1>, vector<2x128x128xf32>
    %cst_18 = arith.constant dense<0.000000e+00> : vector<2x128xf32>
    %41 = vector.multi_reduction <add>, %40, %cst_18 [1] : vector<2x128x128xf32> to vector<2x128xf32>
    %c0_19 = arith.constant 0 : index
    %c0_20 = arith.constant 0 : index
    %c0_21 = arith.constant 0 : index
    %42 = vector.load %arg4[%c0_19, %c0_20, %c0_21] : memref<2x1x128xf32, #tpu.memory_space<vmem>>, vector<2x1x128xf32>
    %43 = vector.shape_cast %42 : vector<2x1x128xf32> to vector<2x128xf32>
    %44 = arith.addf %43, %41 : vector<2x128xf32>
    %45 = vector.shape_cast %44 : vector<2x128xf32> to vector<2x1x128xf32>
    %c0_22 = arith.constant 0 : index
    %c0_23 = arith.constant 0 : index
    %c0_24 = arith.constant 0 : index
    %46 = vector.load %arg6[%c0_22, %c0_23, %c0_24] : memref<2x1x128xf32, #tpu.memory_space<vmem>>, vector<2x1x128xf32>
    tpu.vector_store %arg6[%c0_22, %c0_23, %c0_24], %45 {strides = array<i32>} : memref<2x1x128xf32, #tpu.memory_space<vmem>>, vector<2x1x128xf32>,
    %47 = arith.negf %44 : vector<2x128xf32>
    %48 = math.exp %47 : vector<2x128xf32>
    %cst_25 = arith.constant 1.000000e+00 : f32
    %49 = vector.broadcast %cst_25 : f32 to vector<2x128xf32>
    %50 = arith.addf %49, %48 : vector<2x128xf32>
    %51 = arith.divf %49, %50 : vector<2x128xf32>
    %52 = vector.shape_cast %51 : vector<2x128xf32> to vector<2x1x128xf32>
    %c0_26 = arith.constant 0 : index
    %c0_27 = arith.constant 0 : index
    %c0_28 = arith.constant 0 : index
    %53 = vector.load %arg5[%c0_26, %c0_27, %c0_28] : memref<2x1x128xf32, #tpu.memory_space<vmem>>, vector<2x1x128xf32>
    tpu.vector_store %arg5[%c0_26, %c0_27, %c0_28], %52 {strides = array<i32>} : memref<2x1x128xf32, #tpu.memory_space<vmem>>, vector<2x1x128xf32>,
    return
  }
  func.func @transform_0(%arg0: i32) -> (i32, i32, i32, i32) {
    %c0_i32 = arith.constant 0 : i32
    %c0_i32_0 = arith.constant 0 : i32
    %c0_i32_1 = arith.constant 0 : i32
    %c0_i32_2 = arith.constant 0 : i32
    return %c0_i32, %arg0, %c0_i32_0, %c0_i32_1 : i32, i32, i32, i32
  }
  func.func @transform_1(%arg0: i32) -> (i32, i32, i32, i32) {
    %c0_i32 = arith.constant 0 : i32
    %c0_i32_0 = arith.constant 0 : i32
    %c0_i32_1 = arith.constant 0 : i32
    %c0_i32_2 = arith.constant 0 : i32
    return %c0_i32, %arg0, %c0_i32_0, %c0_i32_1 : i32, i32, i32, i32
  }
  func.func @transform_2(%arg0: i32) -> (i32, i32, i32) {
    %c0_i32 = arith.constant 0 : i32
    %c0_i32_0 = arith.constant 0 : i32
    %c0_i32_1 = arith.constant 0 : i32
    return %arg0, %c0_i32, %c0_i32_0 : i32, i32, i32
  }
  func.func @transform_3(%arg0: i32) -> (i32, i32, i32) {
    %c0_i32 = arith.constant 0 : i32
    %c0_i32_0 = arith.constant 0 : i32
    %c0_i32_1 = arith.constant 0 : i32
    return %arg0, %c0_i32, %c0_i32_0 : i32, i32, i32
  }
  func.func @transform_4(%arg0: i32) -> (i32, i32, i32) {
    %c0_i32 = arith.constant 0 : i32
    %c0_i32_0 = arith.constant 0 : i32
    %c0_i32_1 = arith.constant 0 : i32
    return %arg0, %c0_i32, %c0_i32_0 : i32, i32, i32
  }
  func.func @transform_5(%arg0: i32) -> (i32, i32, i32) {
    %c0_i32 = arith.constant 0 : i32
    %c0_i32_0 = arith.constant 0 : i32
    %c0_i32_1 = arith.constant 0 : i32
    return %arg0, %c0_i32, %c0_i32_0 : i32, i32, i32
  }
}

</mosaic_0001>

<bundles_post_ra>
// kernel: tpu_custom_call.1
= control target key start
LH: loop header
LB: loop body
LE: loop exit
PB: predicated region body
PF: predicated region fallthrough
CT: control target
= control target key end

     0   :  { %11 = vsyncpa [#allocation3], 0  ;;  %vm229_vm0 = vcmask 261120   ;;  %v957_v2 = vlaneseq  ;;  %s3080_s0 = inlined_call_operand.vmem [shape: bf16[2,2,128,32], index: 0, kind: input, shape index: {}]   ;;  %s3081_s1 = inlined_call_operand.vmem [shape: bf16[2,2,128,32], index: 1, kind: input, shape index: {}]   ;;  %s3082_s2 = inlined_call_operand.vmem [shape: f32[2,1,128], index: 2, kind: input, shape index: {}]   ;;  %s3083_s3 = inlined_call_operand.vmem [shape: f32[2,1,128], index: 3, kind: input, shape index: {}]   ;;  %s3084_s4 = inlined_call_operand.hbm [shape: f32[2,1,128], index: 4, kind: output, shape index: {0}]   ;;  %s3085_s5 = inlined_call_operand.hbm [shape: f32[2,1,128], index: 5, kind: output, shape index: {1}]  }
   0x1   :  { %v2076_v0 = vld [vmem:[%s3081_s1 + $0xb8] sm:$0xff]  ;;  %v2075_v8 = vld [vmem:[%s3081_s1 + $0xb0] sm:$0xff] }
   0x2   :  { %v2084_v1 = vld [vmem:[%s3081_s1 + $0xf8] sm:$0xff]  ;;  %v630_v3 = vsel %vm229_vm0, %v2076_v0, 0  ;;  %v2357_v5 = vshrl.u32 %v957_v2, 7  ;;  %v2083_v9 = vld [vmem:[%s3081_s1 + $0xf0] sm:$0xff] }
   0x3   :  { %v807_v4 = vsel %vm229_vm0, %v2084_v1, 0  ;;  %632 = vmatpush.bf16.xpose.msra.mxu2 %v630_v3  ;;  %v2060_v6 = vld [vmem:[%s3081_s1 + $0x38] sm:$0xff]  ;;  %v2059_v14 = vld [vmem:[%s3081_s1 + $0x30] sm:$0xff] }
   0x4   :  { %809 = vmatpush.bf16.xpose.msra.mxu3 %v807_v4  ;;  %v2363_v7 = vadd.s32 16, %v2357_v5  ;;  %v2068_v10 = vld [vmem:[%s3081_s1 + $0x78] sm:$0xff]  ;;  %2089 = vset.pattern.permute.xlu0 %v2357_v5  ;;  %v276_v11 = vsel %vm229_vm0, %v2060_v6, 0  ;;  %v2377_v12 = vadd.s32 32, %v2357_v5 }
   0x5   :  { %278 = vmatpush.bf16.xpose.msra.mxu0 %v276_v11  ;;  %v453_v13 = vsel %vm229_vm0, %v2068_v10, 0 }
   0x6   :  { %2091 = vset.pattern.permute.xlu1 %v2363_v7  ;;  %455 = vmatpush.bf16.xpose.msra.mxu1 %v453_v13 }
   0x7   :  { %2093 = vset.pattern.permute.xlu2 %v2377_v12 }
   0x8   :  { %12 = vsyncpa [#allocation5], 0  ;;  %v627_v15 = vsel %vm229_vm0, %v2075_v8, 0  ;;  %v804_v16 = vsel %vm229_vm0, %v2083_v9, 0  ;;  %v2067_v17 = vld [vmem:[%s3081_s1 + $0x70] sm:$0xff]  ;;  %v273_v19 = vsel %vm229_vm0, %v2059_v14, 0 }
   0x9   :  { %v2393_v18 = vld [vmem:[%s3082_s2] ss:$0 sm:$0xff]  ;;  %v2074_v20 = vld [vmem:[%s3081_s1 + $0xa8] sm:$0xff]  ;;  %v450_v22 = vsel %vm229_vm0, %v2067_v17, 0  ;;  %v2415_v27 = vadd.s32 24, %v2357_v5  ;;  %v2419_v29 = vadd.s32 40, %v2357_v5 }
   0xa   :  { %v2082_v21 = vld [vmem:[%s3081_s1 + $0xe8] sm:$0xff]  ;;  %v624_v24 = vsel %vm229_vm0, %v2074_v20, 0  ;;  %v2073_v30 = vld [vmem:[%s3081_s1 + $0xa0] sm:$0xff]  ;;  %v2072_v38 = vld [vmem:[%s3081_s1 + $0x98] sm:$0xff]  ;;  %v2457_v45 = vadd.s32 48, %v2357_v5  ;;  %v2460_v46 = vadd.s32 8, %v2357_v5 }
   0xb   :  { %633 = vmatpush.bf16.xpose.msra.mxu2 %v627_v15  ;;  %v2058_v23 = vld [vmem:[%s3081_s1 + $0x28] sm:$0xff]  ;;  %v801_v25 = vsel %vm229_vm0, %v2082_v21, 0  ;;  %v2081_v31 = vld [vmem:[%s3081_s1 + $0xe0] sm:$0xff]  ;;  %v621_v34 = vsel %vm229_vm0, %v2073_v30, 0  ;;  %v2080_v39 = vld [vmem:[%s3081_s1 + $0xd8] sm:$0xff]  ;;  %v618_v42 = vsel %vm229_vm0, %v2072_v38, 0 }
   0xc   :  { %810 = vmatpush.bf16.xpose.msra.mxu3 %v804_v16  ;;  %961 = vperm.xlu0 %2089, %v2393_v18   ;;  %v2066_v26 = vld [vmem:[%s3081_s1 + $0x68] sm:$0xff]  ;;  %v270_v28 = vsel %vm229_vm0, %v2058_v23, 0  ;;  %v2057_v33 = vld [vmem:[%s3081_s1 + $0x20] sm:$0xff]  ;;  %v798_v35 = vsel %vm229_vm0, %v2081_v31, 0  ;;  %v2056_v41 = vld [vmem:[%s3081_s1 + $0x18] sm:$0xff]  ;;  %v795_v43 = vsel %vm229_vm0, %v2080_v39, 0 }
   0xd   :  { %279 = vmatpush.bf16.xpose.msra.mxu0 %v273_v19  ;;  %v447_v32 = vsel %vm229_vm0, %v2066_v26, 0  ;;  %v2065_v36 = vld [vmem:[%s3081_s1 + $0x60] sm:$0xff]  ;;  %v267_v37 = vsel %vm229_vm0, %v2057_v33, 0  ;;  %v2064_v44 = vld [vmem:[%s3081_s1 + $0x58] sm:$0xff]  ;;  %v264_v47 = vsel %vm229_vm0, %v2056_v41, 0  ;;  %v2464_v48 = vadd.s32 56, %v2357_v5 }
   0xe   :  { %973 = vperm.xlu1 %2091, %v2393_v18   ;;  %456 = vmatpush.bf16.xpose.msra.mxu1 %v450_v22  ;;  %v444_v40 = vsel %vm229_vm0, %v2065_v36, 0  ;;  %v2071_v49 = vld [vmem:[%s3081_s1 + $0x90] sm:$0xff]  ;;  %v441_v51 = vsel %vm229_vm0, %v2064_v44, 0  ;;  %v2070_v57 = vld [vmem:[%s3081_s1 + $0x88] sm:$0xff]  ;;  %v2504_v0 = vadd.s32 64, %v2357_v5  ;;  %v2069_v3 = vld [vmem:[%s3081_s1 + $0x80] sm:$0xff] }
   0xf   :  { %985 = vperm.xlu2 %2093, %v2393_v18   ;;  %v2079_v50 = vld [vmem:[%s3081_s1 + $0xd0] sm:$0xff]  ;;  %v615_v53 = vsel %vm229_vm0, %v2071_v49, 0  ;;  %v2078_v58 = vld [vmem:[%s3081_s1 + $0xc8] sm:$0xff]  ;;  %v612_v61 = vsel %vm229_vm0, %v2070_v57, 0  ;;  %v2077_v4 = vld [vmem:[%s3081_s1 + $0xc0] sm:$0xff]  ;;  %v609_v9 = vsel %vm229_vm0, %v2069_v3, 0 }
  0x10   :  { %v2055_v52 = vld [vmem:[%s3081_s1 + $0x10] sm:$0xff]  ;;  %v792_v54 = vsel %vm229_vm0, %v2079_v50, 0  ;;  %v2054_v60 = vld [vmem:[%s3081_s1 + $0x8] sm:$0xff]  ;;  %v789_v62 = vsel %vm229_vm0, %v2078_v58, 0  ;;  %v2053_v8 = vld [vmem:[%s3081_s1] sm:$0xff]  ;;  %v786_v10 = vsel %vm229_vm0, %v2077_v4, 0 }
  0x11   :  { %v2063_v55 = vld [vmem:[%s3081_s1 + $0x50] sm:$0xff]  ;;  %v261_v56 = vsel %vm229_vm0, %v2055_v52, 0  ;;  %v2062_v63 = vld [vmem:[%s3081_s1 + $0x48] sm:$0xff]  ;;  %v258_v1 = vsel %vm229_vm0, %v2054_v60, 0  ;;  %v2061_v11 = vld [vmem:[%s3081_s1 + $0x40] sm:$0xff]  ;;  %v255_v14 = vsel %vm229_vm0, %v2053_v8, 0 }
  0x12   :  { %v438_v59 = vsel %vm229_vm0, %v2063_v55, 0  ;;  %v435_v6 = vsel %vm229_vm0, %v2062_v63, 0  ;;  %v2528_v13 = vld [vmem:[%s3082_s2 + $0x1] ss:$0 sm:$0xff]  ;;  %v432_v15 = vsel %vm229_vm0, %v2061_v11, 0  ;;  %v2038_v21 = vld [vmem:[%s3080_s0 + $0x88] sm:$0xff] }
  0x13   :  { %634 = vmatpush.bf16.xpose.msra.mxu2 %v624_v24  ;;  %v2037_v16 = vld [vmem:[%s3080_s0 + $0x80] sm:$0xff]  ;;  %v2046_v22 = vld [vmem:[%s3080_s0 + $0xc8] sm:$0xff]  ;;  %v2039_v26 = vld [vmem:[%s3080_s0 + $0x90] sm:$0xff]  ;;  %v2617_v36 = vadd.s32 80, %v2357_v5  ;;  %v2668_v50 = vadd.s32 112, %v2357_v5  ;;  %v2692_v55 = vadd.s32 104, %v2357_v5 }
  0x14   :  { %811 = vmatpush.bf16.xpose.msra.mxu3 %v801_v25  ;;  %2090 = vset.pattern.permute.xlu0 %v2460_v46  ;;  %v2045_v17 = vld [vmem:[%s3080_s0 + $0xc0] sm:$0xff]  ;;  %v2022_v23 = vld [vmem:[%s3080_s0 + $0x8] sm:$0xff]  ;;  %v2572_v25 = vadd.s32 72, %v2357_v5  ;;  %v2023_v30 = vld [vmem:[%s3080_s0 + $0x10] sm:$0xff]  ;;  %s2314_s28 = smov [#allocation4]   ;;  %s1714_s7 = sshll.u32 %s3085_s5, 4  ;;  %s1715_s7 = int_to_ptr.hbm [resolvable:$true] %s1714_s7 }
  0x15   :  { %280 = vmatpush.bf16.xpose.msra.mxu0 %v270_v28  ;;  %v2021_v19 = vld [vmem:[%s3080_s0] sm:$0xff]  ;;  %v2030_v24 = vld [vmem:[%s3080_s0 + $0x48] sm:$0xff]  ;;  %v2047_v28 = vld [vmem:[%s3080_s0 + $0xd0] sm:$0xff]  ;;  %s1712_s29 = sshll.u32 %s2314_s28, 4  ;;  %s2315_s8 = smov 16   ;;  %s1713_s29 = int_to_ptr.vmem [resolvable:$true] %s1712_s29 }
  0x16   :  { %2092 = vset.pattern.permute.xlu1 %v2415_v27  ;;  %457 = vmatpush.bf16.xpose.msra.mxu1 %v447_v32  ;;  %v2029_v20 = vld [vmem:[%s3080_s0 + $0x40] sm:$0xff]  ;;  %v2031_v31 = vld [vmem:[%s3080_s0 + $0x50] sm:$0xff]  ;;  %v2040_v32 = vld [vmem:[%s3080_s0 + $0x98] sm:$0xff]  ;;  %s2316_s9 = smov 1   ;;  %s1701_s12 = sshll.u32 %s3084_s4, 4  ;;  %s1702_s12 = int_to_ptr.hbm [resolvable:$true] %s1701_s12 }
  0x17   :  { %2094 = vset.pattern.permute.xlu2 %v2419_v29  ;;  %v2048_v33 = vld [vmem:[%s3080_s0 + $0xd8] sm:$0xff]  ;;  %v2041_v38 = vld [vmem:[%s3080_s0 + $0xa0] sm:$0xff]  ;;  %v2026_v44 = vld [vmem:[%s3080_s0 + $0x28] sm:$0xff] }
  0x18   :  { %v2049_v39 = vld [vmem:[%s3080_s0 + $0xe0] sm:$0xff]  ;;  %v2034_v49 = vld [vmem:[%s3080_s0 + $0x68] sm:$0xff]  ;;  %v2043_v52 = vld [vmem:[%s3080_s0 + $0xb0] sm:$0xff] }
  0x19   :  { %v2033_v41 = vld [vmem:[%s3080_s0 + $0x60] sm:$0xff]  ;;  %v2052_v63 = vld [vmem:[%s3080_s0 + $0xf8] sm:$0xff] }
  0x1a   :  { %v2028_v3 = vld [vmem:[%s3080_s0 + $0x38] sm:$0xff] }
  0x1b   :  { %635 = vmatpush.bf16.xpose.msra.mxu2 %v621_v34  ;;  %v2024_v34 = vld [vmem:[%s3080_s0 + $0x18] sm:$0xff] }
  0x1c   :  { %812 = vmatpush.bf16.xpose.msra.mxu3 %v798_v35  ;;  %967 = vperm.xlu0 %2090, %v2393_v18   ;;  %v2032_v35 = vld [vmem:[%s3080_s0 + $0x58] sm:$0xff] }
  0x1d   :  { %281 = vmatpush.bf16.xpose.msra.mxu0 %v267_v37  ;;  %v2624_v37 = vadd.s32 88, %v2357_v5  ;;  %v2036_v4 = vld [vmem:[%s3080_s0 + $0x78] sm:$0xff] }
  0x1e   :  { %979 = vperm.xlu1 %2092, %v2393_v18   ;;  %458 = vmatpush.bf16.xpose.msra.mxu1 %v444_v40  ;;  %v2025_v40 = vld [vmem:[%s3080_s0 + $0x20] sm:$0xff] }
  0x1f   :  { %991 = vperm.xlu2 %2094, %v2393_v18  }
  0x23   :  { %636 = vmatpush.bf16.xpose.msra.mxu2 %v618_v42  ;;  %v2042_v42 = vld [vmem:[%s3080_s0 + $0xa8] sm:$0xff] }
  0x24   :  { %813 = vmatpush.bf16.xpose.msra.mxu3 %v795_v43  ;;  %2097 = vset.pattern.permute.xlu0 %v2504_v0  ;;  %v2050_v43 = vld [vmem:[%s3080_s0 + $0xe8] sm:$0xff] }
  0x25   :  { %282 = vmatpush.bf16.xpose.msra.mxu0 %v264_v47  ;;  %v2662_v47 = vadd.s32 96, %v2357_v5 }
  0x26   :  { %2095 = vset.pattern.permute.xlu1 %v2457_v45  ;;  %459 = vmatpush.bf16.xpose.msra.mxu1 %v441_v51 }
  0x27   :  { %2096 = vset.pattern.permute.xlu2 %v2464_v48 }
  0x2b   :  { %637 = vmatpush.bf16.xpose.msra.mxu2 %v615_v53  ;;  %v2051_v53 = vld [vmem:[%s3080_s0 + $0xf0] sm:$0xff] }
  0x2c   :  { %814 = vmatpush.bf16.xpose.msra.mxu3 %v792_v54  ;;  %1009 = vperm.xlu0 %2097, %v2393_v18   ;;  %v2027_v54 = vld [vmem:[%s3080_s0 + $0x30] sm:$0xff] }
  0x2d   :  { %283 = vmatpush.bf16.xpose.msra.mxu0 %v261_v56  ;;  %v2035_v56 = vld [vmem:[%s3080_s0 + $0x70] sm:$0xff] }
  0x2e   :  { %997 = vperm.xlu1 %2095, %v2393_v18   ;;  %460 = vmatpush.bf16.xpose.msra.mxu1 %v438_v59  ;;  %v2703_v59 = vadd.s32 120, %v2357_v5 }
  0x2f   :  { %1003 = vperm.xlu2 %2096, %v2393_v18  }
  0x33   :  { %638 = vmatpush.bf16.xpose.msra.mxu2 %v612_v61 }
  0x34   :  { %815 = vmatpush.bf16.xpose.msra.mxu3 %v789_v62  ;;  %2102 = vset.pattern.permute.xlu0 %v2377_v12  ;;  %v2044_v62 = vld [vmem:[%s3080_s0 + $0xb8] sm:$0xff] }
  0x35   :  { %284 = vmatpush.bf16.xpose.msra.mxu0 %v258_v1 }
  0x36   :  { %2098 = vset.pattern.permute.xlu1 %v2357_v5  ;;  %461 = vmatpush.bf16.xpose.msra.mxu1 %v435_v6 }
  0x37   :  { %2099 = vset.pattern.permute.xlu2 %v2460_v46 }
  0x3b   :  { %639 = vmatpush.bf16.xpose.msra.mxu2 %v609_v9 }
  0x3c   :  { %816 = vmatpush.bf16.xpose.msra.mxu3 %v786_v10  ;;  %1082 = vperm.xlu0 %2102, %v2528_v13  }
  0x3d   :  { %285 = vmatpush.bf16.xpose.msra.mxu0 %v255_v14 }
  0x3e   :  { %1058 = vperm.xlu1 %2098, %v2528_v13   ;;  %462 = vmatpush.bf16.xpose.msra.mxu1 %v432_v15 }
  0x3f   :  { %1064 = vperm.xlu2 %2099, %v2528_v13  }
  0x42   :  { %1939 = vmatmul.msk.bf16.vlgmr.msra.gmra.mxu2 %vm229_vm0, %v2037_v16 }
  0x43   :  { %2011 = vmatmul.msk.bf16.vlgmr.msra.gmra.mxu3 %vm229_vm0, %v2045_v17 }
  0x44   :  { %1795 = vmatmul.msk.bf16.vlgmr.msra.gmra.mxu0 %vm229_vm0, %v2021_v19  ;;  %2107 = vset.pattern.permute.xlu0 %v2572_v25 }
  0x45   :  { %1867 = vmatmul.msk.bf16.vlgmr.msra.gmra.mxu1 %vm229_vm0, %v2029_v20 }
  0x46   :  { %2100 = vset.pattern.permute.xlu1 %v2363_v7 }
  0x47   :  { %2101 = vset.pattern.permute.xlu2 %v2415_v27 }
  0x4c   :  { %1015 = vperm.xlu0 %2107, %v2393_v18  }
  0x4e   :  { %1070 = vperm.xlu1 %2100, %v2528_v13  }
  0x4f   :  { %1076 = vperm.xlu2 %2101, %v2528_v13  }
  0x52   :  { %1940 = vmatmul.msk.bf16.gmra.mxu2 %vm229_vm0, %v2038_v21 }
  0x53   :  { %2012 = vmatmul.msk.bf16.gmra.mxu3 %vm229_vm0, %v2046_v22 }
  0x54   :  { %1796 = vmatmul.msk.bf16.gmra.mxu0 %vm229_vm0, %v2022_v23  ;;  %2112 = vset.pattern.permute.xlu0 %v2624_v37 }
  0x55   :  { %1868 = vmatmul.msk.bf16.gmra.mxu1 %vm229_vm0, %v2030_v24 }
  0x56   :  { %2103 = vset.pattern.permute.xlu1 %v2419_v29 }
  0x57   :  { %2104 = vset.pattern.permute.xlu2 %v2457_v45 }
  0x5c   :  { %1124 = vperm.xlu0 %2112, %v2528_v13  }
  0x5e   :  { %1088 = vperm.xlu1 %2103, %v2528_v13  }
  0x5f   :  { %1094 = vperm.xlu2 %2104, %v2528_v13  }
  0x62   :  { %1941 = vmatmul.msk.bf16.gmra.mxu2 %vm229_vm0, %v2039_v26 }
  0x63   :  { %2013 = vmatmul.msk.bf16.gmra.mxu3 %vm229_vm0, %v2047_v28 }
  0x64   :  { %1797 = vmatmul.msk.bf16.gmra.mxu0 %vm229_vm0, %v2023_v30  ;;  %2117 = vset.pattern.permute.xlu0 %v2668_v50 }
  0x65   :  { %1869 = vmatmul.msk.bf16.gmra.mxu1 %vm229_vm0, %v2031_v31 }
  0x66   :  { %2105 = vset.pattern.permute.xlu1 %v2464_v48 }
  0x67   :  { %2106 = vset.pattern.permute.xlu2 %v2504_v0 }
  0x69   :  { %v2699_v58 = vpop.permute.xlu2 %985 }
  0x6c   :  { %1045 = vperm.xlu0 %2117, %v2393_v18  }
  0x6e   :  { %1100 = vperm.xlu1 %2105, %v2528_v13  }
  0x6f   :  { %1106 = vperm.xlu2 %2106, %v2528_v13  }
  0x72   :  { %1942 = vmatmul.msk.bf16.gmra.mxu2 %vm229_vm0, %v2040_v32 }
  0x73   :  { %2014 = vmatmul.msk.bf16.gmra.mxu3 %vm229_vm0, %v2048_v33 }
  0x74   :  { %1798 = vmatmul.msk.bf16.gmra.mxu0 %vm229_vm0, %v2024_v34  ;;  %2121 = vset.pattern.permute.xlu0 %v2703_v59 }
  0x75   :  { %1870 = vmatmul.msk.bf16.gmra.mxu1 %vm229_vm0, %v2032_v35 }
  0x76   :  { %2108 = vset.pattern.permute.xlu1 %v2572_v25 }
  0x77   :  { %2109 = vset.pattern.permute.xlu2 %v2617_v36 }
  0x79   :  { %v2711_v61 = vpop.permute.xlu2 %991 }
  0x7e   :  { %1112 = vperm.xlu1 %2108, %v2528_v13   ;;  %v962_v1 = vpop.permute.xlu0 %961 }
  0x7f   :  { %1021 = vperm.xlu2 %2109, %v2393_v18   ;;  %v1156_v9 = vsub.f32 %v962_v1, %v2393_v18 }
  0x80   :  { %v2675_v51 = vpop.permute.xlu1 %973 }
  0x81   :  { %v1188_v11 = vand.u32 2147483647, %v1156_v9  ;;  %v1158_v24 = vsub.f32 %v2675_v51, %v2393_v18 }
  0x82   :  { %1943 = vmatmul.msk.bf16.gmra.mxu2 %vm229_vm0, %v2041_v38 }
  0x83   :  { %2015 = vmatmul.msk.bf16.gmra.mxu3 %vm229_vm0, %v2049_v39  ;;  %v1220_v19 = vadd.f32 1e-10, %v1188_v11  ;;  %v1190_v39 = vand.u32 2147483647, %v1158_v24 }
  0x84   :  { %1799 = vmatmul.msk.bf16.gmra.mxu0 %vm229_vm0, %v2025_v40 }
  0x85   :  { %1871 = vmatmul.msk.bf16.gmra.mxu1 %vm229_vm0, %v2033_v41  ;;  %2124 = vlog2.f32 %v1220_v19 }
  0x86   :  { %2110 = vset.pattern.permute.xlu1 %v2617_v36 }
  0x87   :  { %2111 = vset.pattern.permute.xlu2 %v2624_v37 }
  0x89   :  { %v2729_v8 = vpop.permute.xlu2 %1003 }
  0x8b   :  { %v2125_v38 = vpop.eup %2124 }
  0x8e   :  { %1118 = vperm.xlu1 %2110, %v2528_v13   ;;  %v968_v14 = vpop.permute.xlu0 %967 }
  0x8f   :  { %1027 = vperm.xlu2 %2111, %v2393_v18   ;;  %v1157_v16 = vsub.f32 %v968_v14, %v2393_v18 }
  0x90   :  { %v2697_v57 = vpop.permute.xlu1 %979 }
  0x91   :  { %v1189_v22 = vand.u32 2147483647, %v1157_v16 }
  0x92   :  { %1944 = vmatmul.msk.bf16.gmra.mxu2 %vm229_vm0, %v2042_v42 }
  0x93   :  { %2016 = vmatmul.msk.bf16.gmra.mxu3 %vm229_vm0, %v2050_v43  ;;  %v1221_v30 = vadd.f32 1e-10, %v1189_v22 }
  0x94   :  { %1800 = vmatmul.msk.bf16.gmra.mxu0 %vm229_vm0, %v2026_v44 }
  0x95   :  { %1872 = vmatmul.msk.bf16.gmra.mxu1 %vm229_vm0, %v2034_v49 }
  0x96   :  { %2113 = vset.pattern.permute.xlu1 %v2662_v47 }
  0x97   :  { %2114 = vset.pattern.permute.xlu2 %v2662_v47 }
  0x99   :  { %v1065_v17 = vpop.permute.xlu2 %1064 }
  0x9a   :  { %v1173_v21 = vsub.f32 %v1065_v17, %v2528_v13 }
  0x9c   :  { %v1205_v28 = vand.u32 2147483647, %v1173_v21 }
  0x9e   :  { %1033 = vperm.xlu1 %2113, %v2393_v18   ;;  %v2747_v40 = vpop.permute.xlu0 %1009  ;;  %v1237_v41 = vadd.f32 1e-10, %v1205_v28 }
  0x9f   :  { %1130 = vperm.xlu2 %2114, %v2528_v13  }
  0xa0   :  { %v2709_v60 = vpop.permute.xlu1 %997 }
  0xa2   :  { %1945 = vmatmul.msk.bf16.gmra.mxu2 %vm229_vm0, %v2043_v52  ;;  %v1253_v52 = vmul.f32 0.6931472, %v2125_v38 }
  0xa3   :  { %2017 = vmatmul.msk.bf16.gmra.mxu3 %vm229_vm0, %v2051_v53 }
  0xa4   :  { %1801 = vmatmul.msk.bf16.gmra.mxu0 %vm229_vm0, %v2027_v54 }
  0xa5   :  { %1873 = vmatmul.msk.bf16.gmra.mxu1 %vm229_vm0, %v2035_v56 }
  0xa6   :  { %2115 = vset.pattern.permute.xlu1 %v2692_v55 }
  0xa7   :  { %2116 = vset.pattern.permute.xlu2 %v2692_v55 }
  0xae   :  { %1039 = vperm.xlu1 %2115, %v2393_v18  }
  0xaf   :  { %1136 = vperm.xlu2 %2116, %v2528_v13  }
  0xb0   :  { %v1059_v6 = vpop.permute.xlu1 %1058 }
  0xb1   :  { %v1172_v10 = vsub.f32 %v1059_v6, %v2528_v13  ;;  %v1159_v6 = vsub.f32 %v2697_v57, %v2393_v18  ;;  %v1083_v57 = vpop.permute.xlu0 %1082 }
  0xb2   :  { %1946 = vmatmul.msk.bf16.gmra.mxu2 %vm229_vm0, %v2044_v62  ;;  %v1222_v62 = vadd.f32 1e-10, %v1190_v39 }
  0xb3   :  { %2018 = vmatmul.msk.bf16.gmra.mxu3 %vm229_vm0, %v2052_v63  ;;  %v1204_v15 = vand.u32 2147483647, %v1172_v10 }
  0xb4   :  { %1802 = vmatmul.msk.bf16.gmra.mxu0 %vm229_vm0, %v2028_v3 }
  0xb5   :  { %1874 = vmatmul.msk.bf16.gmra.mxu1 %vm229_vm0, %v2036_v4  ;;  %v1236_v20 = vadd.f32 1e-10, %v1204_v15  ;;  %v1077_v4 = vpop.permute.xlu2 %1076 }
  0xb6   :  { %2118 = vset.pattern.permute.xlu1 %v2668_v50 }
  0xb7   :  { %2119 = vset.pattern.permute.xlu2 %v2703_v59  ;;  %2126 = vlog2.f32 %v1236_v20  ;;  %v1175_v20 = vsub.f32 %v1077_v4, %v2528_v13 }
  0xb8   :  { %2128 = vlog2.f32 %v1221_v30 }
  0xb9   :  { %2130 = vlog2.f32 %v1237_v41  ;;  %v1207_v41 = vand.u32 2147483647, %v1175_v20 }
  0xba   :  { %2132 = vlog2.f32 %v1222_v62 }
  0xbd   :  { %v2127_v49 = vpop.eup %2126 }
  0xbe   :  { %1142 = vperm.xlu1 %2118, %v2528_v13   ;;  %v1285_v63 = vmul.f32 0.6931472, %v2127_v49  ;;  %v2129_v11 = vpop.eup %2128 }
  0xbf   :  { %1051 = vperm.xlu2 %2119, %v2393_v18   ;;  %v1255_v28 = vmul.f32 0.6931472, %v2129_v11 }
  0xc0   :  { %v1071_v26 = vpop.permute.xlu1 %1070 }
  0xc1   :  { %v2741_v23 = vpop.f32.mrf.mxu0  ;;  %v1174_v33 = vsub.f32 %v1071_v26, %v2528_v13  ;;  %v1191_v26 = vand.u32 2147483647, %v1159_v6 }
  0xc2   :  { %v2749_v44 = vpop.f32.mrf.mxu1 }
  0xc3   :  { %v1206_v51 = vand.u32 2147483647, %v1174_v33 }
  0xc5   :  { %v641_v31 = vpop.f32.mrf.mxu2  ;;  %v1238_v14 = vadd.f32 1e-10, %v1206_v51 }
  0xc6   :  { %v818_v32 = vpop.f32.mrf.mxu3  ;;  %2120 = vset.pattern.permute.xlu1 %v2703_v59  ;;  %v858_v34 = vadd.f32 1.0, %v641_v31  ;;  %v2131_v31 = vpop.eup %2130 }
  0xc7   :  { %v874_v35 = vadd.f32 1.0, %v818_v32  ;;  %2134 = vlog2.f32 %v1238_v14  ;;  %v1287_v49 = vmul.f32 0.6931472, %v2131_v31  ;;  %v2133_v62 = vpop.eup %2132 }
  0xc8   :  { %v890_v42 = vmax.f32 %v858_v34, 0.0 }
  0xc9   :  { %v906_v43 = vmax.f32 %v874_v35, 0.0  ;;  %v2751_v56 = vpop.f32.mrf.mxu0 }
  0xca   :  { %v922_v53 = vmin.f32 %v890_v42, 10.0  ;;  %v2757_v35 = vpop.f32.mrf.mxu1  ;;  %v1160_v42 = vsub.f32 %v2699_v58, %v2393_v18 }
  0xcb   :  { %v938_v54 = vmin.f32 %v906_v43, 10.0 }
  0xcc   :  { %v1316_v1 = vsub.f32 0.0, %v922_v53  ;;  %v1192_v11 = vand.u32 2147483647, %v1160_v42 }
  0xcd   :  { %v1332_v3 = vsub.f32 0.0, %v938_v54  ;;  %v643_v9 = vpop.f32.mrf.mxu2  ;;  %v1176_v54 = vsub.f32 %v1083_v57, %v2528_v13 }
  0xce   :  { %v820_v10 = vpop.f32.mrf.mxu3  ;;  %v1348_v15 = vmul.f32 %v1316_v1, %v1253_v52  ;;  %1148 = vperm.xlu1 %2120, %v2528_v13   ;;  %v859_v17 = vadd.f32 1.0, %v643_v9  ;;  %v1239_v9 = vadd.f32 1e-10, %v1207_v41 }
  0xcf   :  { %v1364_v16 = vmul.f32 %v1332_v3, %v1285_v63  ;;  %v875_v19 = vadd.f32 1.0, %v820_v10  ;;  %v1223_v63 = vadd.f32 1e-10, %v1191_v26  ;;  %v2135_v10 = vpop.eup %2134 }
  0xd0   :  { %v1380_v21 = vmin.f32 %v1348_v15, 85.0  ;;  %v891_v24 = vmax.f32 %v859_v17, 0.0 }
  0xd1   :  { %v1396_v22 = vmin.f32 %v1364_v16, 85.0  ;;  %v907_v30 = vmax.f32 %v875_v19, 0.0  ;;  %v2759_v38 = vpop.f32.mrf.mxu0  ;;  %v1257_v16 = vmul.f32 0.6931472, %v2133_v62  ;;  %v1208_v19 = vand.u32 2147483647, %v1176_v54 }
  0xd2   :  { %v1412_v32 = vmul.f32 1.442695, %v1380_v21  ;;  %v923_v34 = vmin.f32 %v891_v24, 10.0 }
  0xd3   :  { %v1444_v33 = vmul.f32 1.442695, %v1396_v22  ;;  %v939_v39 = vmin.f32 %v907_v30, 10.0 }
  0xd4   :  { %2136 = vpow2.f32 %v1412_v32  ;;  %v1317_v43 = vsub.f32 0.0, %v923_v34 }
  0xd5   :  { %2138 = vpow2.f32 %v1444_v33  ;;  %v1333_v51 = vsub.f32 0.0, %v939_v39  ;;  %v646_v52 = vpop.f32.mrf.mxu2  ;;  %v2768_v39 = vpop.f32.mrf.mxu1 }
  0xd6   :  { %v823_v53 = vpop.f32.mrf.mxu3  ;;  %v1349_v1 = vmul.f32 %v1317_v43, %v1255_v28  ;;  %v860_v3 = vadd.f32 1.0, %v646_v52  ;;  %2140 = vlog2.f32 %v1223_v63  ;;  %v1289_v28 = vmul.f32 0.6931472, %v2135_v10 }
  0xd7   :  { %v876_v4 = vadd.f32 1.0, %v823_v53  ;;  %v1365_v6 = vmul.f32 %v1333_v51, %v1287_v49  ;;  %2142 = vlog2.f32 %v1239_v9  ;;  %v1240_v43 = vadd.f32 1e-10, %v1208_v19 }
  0xd8   :  { %v1381_v14 = vmin.f32 %v1349_v1, 85.0  ;;  %v892_v58 = vmax.f32 %v860_v3, 0.0  ;;  %v1224_v49 = vadd.f32 1e-10, %v1192_v11  ;;  %v2771_v53 = vand.u32 127, %v957_v2 }
  0xd9   :  { %v908_v15 = vmax.f32 %v876_v4, 0.0  ;;  %v1397_v17 = vmin.f32 %v1365_v6, 85.0  ;;  %v2764_v30 = vpop.f32.mrf.mxu0 }
  0xda   :  { %v2137_v20 = vpop.eup %2136  ;;  %v1414_v21 = vmul.f32 1.442695, %v1381_v14  ;;  %v924_v22 = vmin.f32 %v892_v58, 10.0  ;;  %vm1527_vm1 = vcmp.lt.s32.totalorder %v2357_v5, %v2771_v53  ;;  %vm1528_vm2 = vcmp.lt.s32.totalorder %v2460_v46, %v2771_v53 }
  0xdb   :  { %v940_v24 = vmin.f32 %v908_v15, 10.0  ;;  %v2139_v26 = vpop.eup %2138  ;;  %v1446_v57 = vmul.f32 1.442695, %v1397_v17  ;;  %v1476_v31 = vmul.f32 %v2137_v20, %v2741_v23  ;;  %vm1529_vm3 = vcmp.lt.s32.totalorder %v2363_v7, %v2771_v53 }
  0xdc   :  { %2144 = vpow2.f32 %v1414_v21  ;;  %v1318_v32 = vsub.f32 0.0, %v924_v22  ;;  %v1492_v34 = vmul.f32 %v2139_v26, %v2749_v44  ;;  %v2141_v23 = vpop.eup %2140  ;;  %v1161_v5 = vsub.f32 %v2711_v61, %v2393_v18 }
  0xdd   :  { %v1334_v33 = vsub.f32 0.0, %v940_v24  ;;  %2146 = vpow2.f32 %v1446_v57  ;;  %v648_v41 = vpop.f32.mrf.mxu2  ;;  %v2143_v3 = vpop.eup %2142  ;;  %v1575_v17 = vsel %vm1527_vm1, %v1476_v31, 0.0  ;;  %vm1530_vm4 = vcmp.lt.s32.totalorder %v2415_v27, %v2771_v53 }
  0xde   :  { %v825_v42 = vpop.f32.mrf.mxu3  ;;  %v1350_v51 = vmul.f32 %v1318_v32, %v1257_v16  ;;  %v861_v54 = vadd.f32 1.0, %v648_v41  ;;  %2148 = vlog2.f32 %v1240_v43  ;;  %v1259_v16 = vmul.f32 0.6931472, %v2141_v23 }
  0xdf   :  { %v1366_v52 = vmul.f32 %v1334_v33, %v1289_v28  ;;  %v877_v62 = vadd.f32 1.0, %v825_v42  ;;  %2150 = vlog2.f32 %v1224_v49  ;;  %v1291_v20 = vmul.f32 0.6931472, %v2143_v3  ;;  %v2784_v33 = vpop.f32.mrf.mxu1 }
  0xe0   :  { %v1382_v63 = vmin.f32 %v1350_v51, 85.0  ;;  %v893_v4 = vmax.f32 %v861_v54, 0.0  ;;  %v1591_v41 = vsel %vm1527_vm1, %v1492_v34, 0.0  ;;  %vm1531_vm5 = vcmp.lt.s32.totalorder %v2377_v12, %v2771_v53  ;;  %v1016_v12 = vpop.permute.xlu0 %1015 }
  0xe1   :  { %v1398_v1 = vmin.f32 %v1366_v52, 85.0  ;;  %v909_v44 = vmax.f32 %v877_v62, 0.0  ;;  %v2775_v11 = vpop.f32.mrf.mxu0  ;;  %vm1532_vm6 = vcmp.lt.s32.totalorder %v2419_v29, %v2771_v53  ;;  %vm1533_vm7 = vcmp.lt.s32.totalorder %v2457_v45, %v2771_v53  ;;  %v2906_v29 = vld [vmem:[%s3082_s2 + $0x1] ss:$0 sm:$0xff] }
  0xe2   :  { %v2145_v6 = vpop.eup %2144  ;;  %v1416_v9 = vmul.f32 1.442695, %v1382_v63  ;;  %v925_v14 = vmin.f32 %v893_v4, 10.0  ;;  %v1089_v63 = vpop.permute.xlu1 %1088  ;;  %vm1534_vm8 = vcmp.lt.s32.totalorder %v2464_v48, %v2771_v53  ;;  %vm1535_vm9 = vcmp.lt.s32.totalorder %v2504_v0, %v2771_v53 }
  0xe3   :  { %v1448_v10 = vmul.f32 1.442695, %v1398_v1  ;;  %v2147_v2 = vpop.eup %2146  ;;  %v941_v58 = vmin.f32 %v909_v44, 10.0  ;;  %v1477_v15 = vmul.f32 %v2145_v6, %v2751_v56  ;;  %vm1536_vm10 = vcmp.lt.s32.totalorder %v2572_v25, %v2771_v53 }
  0xe4   :  { %2152 = vpow2.f32 %v1416_v9  ;;  %v1493_v19 = vmul.f32 %v2147_v2, %v2757_v35  ;;  %v1319_v21 = vsub.f32 0.0, %v925_v14  ;;  %v2149_v46 = vpop.eup %2148  ;;  %vm1537_vm11 = vcmp.lt.s32.totalorder %v2617_v36, %v2771_v53 }
  0xe5   :  { %2154 = vpow2.f32 %v1448_v10  ;;  %v1335_v22 = vsub.f32 0.0, %v941_v58  ;;  %v651_v24 = vpop.f32.mrf.mxu2  ;;  %v1576_v28 = vsel %vm1528_vm2, %v1477_v15, 0.0  ;;  %v2151_v43 = vpop.eup %2150  ;;  %v1293_v1 = vmul.f32 0.6931472, %v2149_v46 }
  0xe6   :  { %v828_v26 = vpop.f32.mrf.mxu3  ;;  %v1592_v57 = vsel %vm1528_vm2, %v1493_v19, 0.0  ;;  %v862_v56 = vadd.f32 1.0, %v651_v24  ;;  %v1351_v31 = vmul.f32 %v1319_v21, %v1259_v16  ;;  %v1607_v35 = vadd.f32 %v1576_v28, %v1575_v17 }
  0xe7   :  { %v878_v32 = vadd.f32 1.0, %v828_v26  ;;  %v1367_v42 = vmul.f32 %v1335_v22, %v1291_v20  ;;  %v1628_v49 = vadd.f32 %v1592_v57, %v1591_v41  ;;  %v1261_v10 = vmul.f32 0.6931472, %v2151_v43  ;;  %v1095_v20 = vpop.permute.xlu2 %1094 }
  0xe8   :  { %v894_v51 = vmax.f32 %v862_v56, 0.0  ;;  %v1383_v54 = vmin.f32 %v1351_v31, 85.0  ;;  %v1177_v16 = vsub.f32 %v1089_v63, %v2528_v13  ;;  %v1193_v22 = vand.u32 2147483647, %v1161_v5  ;;  %v474_v56 = vpop.f32.mrf.mxu1 }
  0xe9   :  { %v910_v52 = vmax.f32 %v878_v32, 0.0  ;;  %v1399_v62 = vmin.f32 %v1367_v42, 85.0  ;;  %v2795_v15 = vpop.f32.mrf.mxu0  ;;  %vm1538_vm12 = vcmp.lt.s32.totalorder %v2624_v37, %v2771_v53  ;;  %vm1539_vm13 = vcmp.lt.s32.totalorder %v2662_v47, %v2771_v53 }
  0xea   :  { %v2153_v23 = vpop.eup %2152  ;;  %v926_v3 = vmin.f32 %v894_v51, 10.0  ;;  %v1418_v34 = vmul.f32 1.442695, %v1383_v54  ;;  %v1209_v32 = vand.u32 2147483647, %v1177_v16  ;;  %vm1540_vm14 = vcmp.lt.s32.totalorder %v2692_v55, %v2771_v53 }
  0xeb   :  { %v942_v4 = vmin.f32 %v910_v52, 10.0  ;;  %v2155_v44 = vpop.eup %2154  ;;  %v1450_v6 = vmul.f32 1.442695, %v1399_v62  ;;  %v1478_v9 = vmul.f32 %v2153_v23, %v2759_v38  ;;  %v1225_v42 = vadd.f32 1e-10, %v1193_v22 }
  0xec   :  { %v1320_v2 = vsub.f32 0.0, %v926_v3  ;;  %v1494_v58 = vmul.f32 %v2155_v44, %v2768_v39  ;;  %2156 = vpow2.f32 %v1418_v34  ;;  %v1241_v54 = vadd.f32 1e-10, %v1209_v32 }
  0xed   :  { %v1336_v14 = vsub.f32 0.0, %v942_v4  ;;  %v1577_v17 = vsel %vm1529_vm3, %v1478_v9, 0.0  ;;  %v653_v19 = vpop.f32.mrf.mxu2  ;;  %2158 = vpow2.f32 %v1450_v6  ;;  %v1178_v23 = vsub.f32 %v1095_v20, %v2528_v13 }
  0xee   :  { %v830_v61 = vpop.f32.mrf.mxu3  ;;  %v1352_v21 = vmul.f32 %v1320_v2, %v1261_v10  ;;  %v1608_v24 = vadd.f32 %v1607_v35, %v1577_v17  ;;  %v1593_v39 = vsel %vm1529_vm3, %v1494_v58, 0.0  ;;  %v863_v43 = vadd.f32 1.0, %v653_v19  ;;  %v1101_v19 = vpop.permute.xlu1 %1100 }
  0xef   :  { %v1368_v38 = vmul.f32 %v1336_v14, %v1293_v1  ;;  %v1629_v57 = vadd.f32 %v1628_v49, %v1593_v39  ;;  %v1162_v35 = vsub.f32 %v2709_v60, %v2393_v18  ;;  %v879_v7 = vadd.f32 1.0, %v830_v61  ;;  %v2810_v63 = vpop.permute.xlu2 %1106 }
  0xf0   :  { %v1384_v26 = vmin.f32 %v1352_v21, 85.0  ;;  %v895_v60 = vmax.f32 %v863_v43, 0.0  ;;  %v1210_v10 = vand.u32 2147483647, %v1178_v23  ;;  %v2823_v2 = vpop.f32.mrf.mxu1  ;;  %vm1541_vm15 = vcmp.lt.s32.totalorder %v2668_v50, %v2771_v53 }
  0xf1   :  { %v1400_v28 = vmin.f32 %v1368_v38, 85.0  ;;  %v2816_v4 = vpop.f32.mrf.mxu0  ;;  %v911_v5 = vmax.f32 %v879_v7, 0.0  ;;  %v1179_v7 = vsub.f32 %v1101_v19, %v2528_v13  ;;  %vm1542_vm0 = vcmp.lt.s32.totalorder %v2703_v59, %v2771_v53  ;;  %v1650_v59 = vld [vmem:[%s3083_s3 + $0x1] sm:$0x1] }
  0xf2   :  { %v1420_v46 = vmul.f32 1.442695, %v1384_v26  ;;  %v2157_v31 = vpop.eup %2156  ;;  %v927_v14 = vmin.f32 %v895_v60, 10.0  ;;  %v1180_v60 = vsub.f32 %v2810_v63, %v2528_v13 }
  0xf3   :  { %v1452_v41 = vmul.f32 1.442695, %v1400_v28  ;;  %v2159_v51 = vpop.eup %2158  ;;  %v1479_v52 = vmul.f32 %v2157_v31, %v2764_v30  ;;  %v1194_v30 = vand.u32 2147483647, %v1162_v35  ;;  %v943_v61 = vmin.f32 %v911_v5, 10.0 }
  0xf4   :  { %2160 = vpow2.f32 %v1420_v46  ;;  %v1495_v3 = vmul.f32 %v2159_v51, %v2784_v33  ;;  %v1164_v51 = vsub.f32 %v2747_v40, %v2393_v18  ;;  %v1211_v5 = vand.u32 2147483647, %v1179_v7 }
  0xf5   :  { %2162 = vpow2.f32 %v1452_v41  ;;  %v656_v49 = vpop.f32.mrf.mxu2  ;;  %v1578_v1 = vsel %vm1530_vm4, %v1479_v52, 0.0  ;;  %v1226_v17 = vadd.f32 1e-10, %v1194_v30  ;;  %v1337_v41 = vsub.f32 0.0, %v943_v61 }
  0xf6   :  { %v833_v62 = vpop.f32.mrf.mxu3  ;;  %v1609_v44 = vadd.f32 %v1608_v24, %v1578_v1  ;;  %2164 = vlog2.f32 %v1225_v42  ;;  %v1594_v34 = vsel %vm1530_vm4, %v1495_v3, 0.0  ;;  %v864_v58 = vadd.f32 1.0, %v656_v49 }
  0xf7   :  { %2166 = vlog2.f32 %v1241_v54  ;;  %v1630_v6 = vadd.f32 %v1629_v57, %v1594_v34  ;;  %v1242_v24 = vadd.f32 1e-10, %v1210_v10  ;;  %v880_v39 = vadd.f32 1.0, %v833_v62  ;;  %v1022_v26 = vpop.permute.xlu2 %1021 }
  0xf8   :  { %v1321_v57 = vsub.f32 0.0, %v927_v14  ;;  %v896_v32 = vmax.f32 %v864_v58, 0.0  ;;  %2168 = vlog2.f32 %v1226_v17  ;;  %v2843_v1 = vpop.f32.mrf.mxu1  ;;  %v1196_v3 = vand.u32 2147483647, %v1164_v51 }
  0xf9   :  { %v2838_v42 = vpop.f32.mrf.mxu0  ;;  %2170 = vlog2.f32 %v1242_v24  ;;  %v912_v52 = vmax.f32 %v880_v39, 0.0  ;;  %v1165_v14 = vsub.f32 %v1016_v12, %v2393_v18  ;;  %v1243_v39 = vadd.f32 1e-10, %v1211_v5 }
  0xfa   :  { %v2161_v9 = vpop.eup %2160  ;;  %v928_v49 = vmin.f32 %v896_v32, 10.0 }
  0xfb   :  { %v2163_v33 = vpop.eup %2162  ;;  %v1480_v16 = vmul.f32 %v2161_v9, %v2775_v11  ;;  %v944_v34 = vmin.f32 %v912_v52, 10.0 }
  0xfc   :  { %v1496_v20 = vmul.f32 %v2163_v33, %v474_v56  ;;  %v2165_v22 = vpop.eup %2164  ;;  %v1163_v56 = vsub.f32 %v2729_v8, %v2393_v18  ;;  %v1113_v8 = vpop.permute.xlu1 %1112  ;;  %v1322_v33 = vsub.f32 0.0, %v928_v49 }
  0xfd   :  { %v1579_v27 = vsel %vm1531_vm5, %v1480_v16, 0.0  ;;  %v658_v21 = vpop.f32.mrf.mxu2  ;;  %v2167_v28 = vpop.eup %2166  ;;  %v1263_v43 = vmul.f32 0.6931472, %v2165_v22  ;;  %v1181_v19 = vsub.f32 %v1113_v8, %v2528_v13  ;;  %v2855_v22 = vld [vmem:[%s3082_s2] ss:$0 sm:$0xff] }
  0xfe   :  { %v835_v38 = vpop.f32.mrf.mxu3  ;;  %v2829_v46 = vadd.f32 %v1609_v44, %v1579_v27  ;;  %v1595_v11 = vsel %vm1531_vm5, %v1496_v20, 0.0  ;;  %v1295_v35 = vmul.f32 0.6931472, %v2167_v28  ;;  %v1195_v62 = vand.u32 2147483647, %v1163_v56  ;;  %v2169_v40 = vpop.eup %2168 }
  0xff   :  { %v2836_v31 = vadd.f32 %v1630_v6, %v1595_v11  ;;  %v1353_v54 = vmul.f32 %v1321_v57, %v1263_v43  ;;  %v1166_v6 = vsub.f32 %v1022_v26, %v2393_v18  ;;  %v1028_v9 = vpop.permute.xlu2 %1027  ;;  %v2171_v58 = vpop.eup %2170  ;;  %v865_v61 = vadd.f32 1.0, %v658_v21 }
 0x100   :  { %v1369_v23 = vmul.f32 %v1337_v41, %v1295_v35  ;;  %v1227_v16 = vadd.f32 1e-10, %v1195_v62  ;;  %v1265_v63 = vmul.f32 0.6931472, %v2169_v40  ;;  %v1228_v20 = vadd.f32 1e-10, %v1196_v3  ;;  %v1125_v57 = vpop.permute.xlu0 %1124  ;;  %v2865_v8 = vpop.f32.mrf.mxu1 }
 0x101   :  { %v1385_v10 = vmin.f32 %v1353_v54, 85.0  ;;  %v1212_v27 = vand.u32 2147483647, %v1180_v60  ;;  %v1167_v24 = vsub.f32 %v1028_v9, %v2855_v22  ;;  %v1338_v26 = vsub.f32 0.0, %v944_v34  ;;  %v2858_v32 = vpop.f32.mrf.mxu0 }
 0x102   :  { %v1401_v17 = vmin.f32 %v1369_v23, 85.0  ;;  %v881_v28 = vadd.f32 1.0, %v835_v38  ;;  %v1198_v18 = vand.u32 2147483647, %v1166_v6  ;;  %v1297_v11 = vmul.f32 0.6931472, %v2171_v58 }
 0x103   :  { %v1422_v56 = vmul.f32 1.442695, %v1385_v10  ;;  %v1354_v21 = vmul.f32 %v1322_v33, %v1265_v63  ;;  %v1197_v41 = vand.u32 2147483647, %v1165_v14  ;;  %2172 = vlog2.f32 %v1227_v16 }
 0x104   :  { %v1454_v43 = vmul.f32 1.442695, %v1401_v17  ;;  %v1213_v51 = vand.u32 2147483647, %v1181_v19  ;;  %v897_v35 = vmax.f32 %v865_v61, 0.0  ;;  %2174 = vlog2.f32 %v1228_v20  ;;  %v1119_v34 = vpop.permute.xlu1 %1118 }
 0x105   :  { %v661_v44 = vpop.f32.mrf.mxu2  ;;  %v1244_v7 = vadd.f32 1e-10, %v1212_v27  ;;  %v1199_v54 = vand.u32 2147483647, %v1167_v24  ;;  %v1183_v38 = vsub.f32 %v1125_v57, %v2528_v13  ;;  %2176 = vlog2.f32 %v1243_v39 }
 0x106   :  { %v2847_v30 = vpop.f32.mrf.mxu3  ;;  %v1370_v49 = vmul.f32 %v1338_v26, %v1297_v11  ;;  %v913_v62 = vmax.f32 %v881_v28, 0.0  ;;  %v1230_v23 = vadd.f32 1e-10, %v1198_v18  ;;  %2178 = vpow2.f32 %v1422_v56 }
 0x107   :  { %v1386_v3 = vmin.f32 %v1354_v21, 85.0  ;;  %v1229_v60 = vadd.f32 1e-10, %v1197_v41  ;;  %2180 = vpow2.f32 %v1454_v43  ;;  %v1245_v40 = vadd.f32 1e-10, %v1213_v51  ;;  %v1131_v16 = vpop.permute.xlu2 %1130 }
 0x108   :  { %v929_v5 = vmin.f32 %v897_v35, 10.0  ;;  %2182 = vlog2.f32 %v1244_v7  ;;  %v866_v6 = vadd.f32 1.0, %v661_v44  ;;  %v1231_v9 = vadd.f32 1e-10, %v1199_v54 }
 0x109   :  { %v1215_v10 = vand.u32 2147483647, %v1183_v38  ;;  %v2173_v33 = vpop.eup %2172  ;;  %v1402_v14 = vmin.f32 %v1370_v49, 85.0  ;;  %v945_v58 = vmin.f32 %v913_v62, 10.0  ;;  %2184 = vlog2.f32 %v1230_v23  ;;  %v2869_v24 = vpop.f32.mrf.mxu0 }
 0x10a   :  { %v2175_v17 = vpop.eup %2174  ;;  %v1424_v19 = vmul.f32 1.442695, %v1386_v3  ;;  %v1182_v61 = vsub.f32 %v1119_v34, %v2528_v13  ;;  %v882_v63 = vadd.f32 1.0, %v2847_v30  ;;  %2186 = vlog2.f32 %v1229_v60  ;;  %v2877_v23 = vpop.f32.mrf.mxu1 }
 0x10b   :  { %v2177_v20 = vpop.eup %2176  ;;  %2188 = vlog2.f32 %v1245_v40  ;;  %v1323_v27 = vsub.f32 0.0, %v929_v5  ;;  %v898_v39 = vmax.f32 %v866_v6, 0.0  ;;  %v1247_v18 = vadd.f32 1e-10, %v1215_v10 }
 0x10c   :  { %v2179_v44 = vpop.eup %2178  ;;  %2190 = vlog2.f32 %v1231_v9  ;;  %v1267_v11 = vmul.f32 0.6931472, %v2173_v33  ;;  %v1456_v56 = vmul.f32 1.442695, %v1402_v14  ;;  %v1339_v21 = vsub.f32 0.0, %v945_v58 }
 0x10d   :  { %v2860_v52 = vpop.f32.mrf.mxu2  ;;  %v2181_v57 = vpop.eup %2180  ;;  %v1184_v30 = vsub.f32 %v1131_v16, %v2528_v13  ;;  %2192 = vpow2.f32 %v1424_v19  ;;  %v1214_v43 = vand.u32 2147483647, %v1182_v61  ;;  %v914_v51 = vmax.f32 %v882_v63, 0.0 }
 0x10e   :  { %v2862_v12 = vpop.f32.mrf.mxu3  ;;  %v2183_v41 = vpop.eup %2182  ;;  %v1269_v7 = vmul.f32 0.6931472, %v2175_v17  ;;  %v1299_v54 = vmul.f32 0.6931472, %v2177_v20  ;;  %v1355_v38 = vmul.f32 %v1323_v27, %v1267_v11  ;;  %v1481_v49 = vmul.f32 %v2179_v44, %v2795_v15 }
 0x10f   :  { %v2185_v35 = vpop.eup %2184  ;;  %v1497_v60 = vmul.f32 %v2181_v57, %v2823_v2  ;;  %v930_v13 = vmin.f32 %v898_v39, 10.0  ;;  %2194 = vlog2.f32 %v1247_v18  ;;  %v1301_v5 = vmul.f32 0.6931472, %v2183_v41  ;;  %v1137_v17 = vpop.permute.xlu2 %1136 }
 0x110   :  { %v1034_v62 = vpop.permute.xlu1 %1033  ;;  %v2187_v3 = vpop.eup %2186  ;;  %2196 = vpow2.f32 %v1456_v56  ;;  %v1371_v34 = vmul.f32 %v1339_v21, %v1299_v54  ;;  %v1216_v6 = vand.u32 2147483647, %v1184_v30  ;;  %v2882_v10 = vmul.f32 0.6931472, %v2185_v35 }
 0x111   :  { %v2189_v40 = vpop.eup %2188  ;;  %v1246_v15 = vadd.f32 1e-10, %v1214_v43  ;;  %v946_v33 = vmin.f32 %v914_v51, 10.0  ;;  %v1387_v14 = vmin.f32 %v1355_v38, 85.0  ;;  %v1580_v58 = vsel %vm1532_vm6, %v1481_v49, 0.0  ;;  %v2909_v41 = vpop.f32.mrf.mxu0 }
 0x112   :  { %v2191_v9 = vpop.eup %2190  ;;  %v2887_v16 = vmul.f32 0.6931472, %v2187_v3  ;;  %v867_v2 = vadd.f32 1.0, %v2860_v52  ;;  %v2890_v61 = vmul.f32 0.6931472, %v2189_v40  ;;  %v1596_v63 = vsel %vm1532_vm6, %v1497_v60, 0.0 }
 0x113   :  { %v2193_v19 = vpop.eup %2192  ;;  %v1324_v20 = vsub.f32 0.0, %v930_v13  ;;  %v1168_v27 = vsub.f32 %v1034_v62, %v2855_v22  ;;  %v1403_v18 = vmin.f32 %v1371_v34, 85.0  ;;  %v2900_v57 = vmul.f32 0.6931472, %v2191_v9  ;;  %v1046_v9 = vpop.permute.xlu0 %1045 }
 0x114   :  { %v1248_v52 = vadd.f32 1e-10, %v1216_v6  ;;  %2198 = vlog2.f32 %v1246_v15  ;;  %v1611_v56 = vadd.f32 %v2829_v46, %v1580_v58  ;;  %v1340_v21 = vsub.f32 0.0, %v946_v33  ;;  %v2918_v6 = vpop.f32.mrf.mxu1 }
 0x115   :  { %v2871_v26 = vpop.f32.mrf.mxu2  ;;  %v2195_v11 = vpop.eup %2194  ;;  %v1185_v30 = vsub.f32 %v1137_v17, %v2906_v29  ;;  %v1426_v51 = vmul.f32 1.442695, %v1387_v14  ;;  %v1632_v35 = vadd.f32 %v2836_v31, %v1596_v63  ;;  %v1482_v54 = vmul.f32 %v2193_v19, %v2816_v4 }
 0x116   :  { %v2873_v28 = vpop.f32.mrf.mxu3  ;;  %v2197_v43 = vpop.eup %2196  ;;  %v899_v38 = vmax.f32 %v867_v2, 0.0  ;;  %v1356_v62 = vmul.f32 %v1324_v20, %v1269_v7  ;;  %v1200_v46 = vand.u32 2147483647, %v1168_v27  ;;  %v868_v3 = vadd.f32 1.0, %v2871_v26 }
 0x117   :  { %v1458_v13 = vmul.f32 1.442695, %v1403_v18  ;;  %v883_v40 = vadd.f32 1.0, %v2862_v12  ;;  %v2916_v34 = vmul.f32 0.6931472, %v2195_v11  ;;  %2200 = vlog2.f32 %v1248_v52 }
 0x118   :  { %v1372_v31 = vmul.f32 %v1340_v21, %v1301_v5  ;;  %v1498_v4 = vmul.f32 %v2197_v43, %v2843_v1  ;;  %v1217_v33 = vand.u32 2147483647, %v1185_v30  ;;  %2202 = vpow2.f32 %v1426_v51 }
 0x119   :  { %v1581_v26 = vsel %vm1533_vm7, %v1482_v54, 0.0  ;;  %v931_v7 = vmin.f32 %v899_v38, 10.0  ;;  %v1388_v12 = vmin.f32 %v1356_v62, 85.0  ;;  %v1232_v2 = vadd.f32 1e-10, %v1200_v46  ;;  %v2931_v46 = vpop.f32.mrf.mxu0 }
 0x11a   :  { %v2199_v58 = vpop.eup %2198  ;;  %v900_v17 = vmax.f32 %v868_v3, 0.0  ;;  %v1170_v20 = vsub.f32 %v1046_v9, %v2855_v22  ;;  %2204 = vpow2.f32 %v1458_v13  ;;  %v915_v5 = vmax.f32 %v883_v40, 0.0 }
 0x11b   :  { %v884_v1 = vadd.f32 1.0, %v2873_v28  ;;  %v1597_v18 = vsel %vm1533_vm7, %v1498_v4, 0.0  ;;  %v1249_v11 = vadd.f32 1e-10, %v1217_v33  ;;  %v2929_v30 = vmul.f32 0.6931472, %v2199_v58  ;;  %v1052_v28 = vpop.permute.xlu2 %1051 }
 0x11c   :  { %v1325_v43 = vsub.f32 0.0, %v931_v7  ;;  %v1428_v38 = vmul.f32 1.442695, %v1388_v12  ;;  %2206 = vlog2.f32 %v1232_v2  ;;  %v1202_v62 = vand.u32 2147483647, %v1170_v20 }
 0x11d   :  { %v668_v44 = vpop.f32.mrf.mxu2  ;;  %v2201_v21 = vpop.eup %2200  ;;  %v2935_v45 = vadd.f32 %v1632_v35, %v1597_v18  ;;  %v947_v13 = vmin.f32 %v915_v5, 10.0  ;;  %v916_v40 = vmax.f32 %v884_v1, 0.0  ;;  %2208 = vlog2.f32 %v1249_v11 }
 0x11e   :  { %v2896_v39 = vpop.f32.mrf.mxu3  ;;  %v869_v15 = vadd.f32 1.0, %v668_v44  ;;  %v1404_v44 = vmin.f32 %v1372_v31, 85.0  ;;  %v2203_v3 = vpop.eup %2202  ;;  %v1357_v33 = vmul.f32 %v1325_v43, %v2887_v16  ;;  %v1234_v2 = vadd.f32 1e-10, %v1202_v62 }
 0x11f   :  { %v885_v4 = vadd.f32 1.0, %v2896_v39  ;;  %v2947_v39 = vmul.f32 %v2203_v3, %v2838_v42 }
 0x120   :  { %v1040_v49 = vpop.permute.xlu1 %1039  ;;  %v901_v52 = vmax.f32 %v869_v15, 0.0  ;;  %v1460_v9 = vmul.f32 1.442695, %v1404_v44  ;;  %v2938_v15 = vpop.eup %2204  ;;  %v1389_v44 = vmin.f32 %v1357_v33, 85.0 }
 0x121   :  { %v1169_v60 = vsub.f32 %v1040_v49, %v2855_v22  ;;  %v932_v49 = vmin.f32 %v900_v17, 10.0  ;;  %v1341_v17 = vsub.f32 0.0, %v947_v13  ;;  %v917_v1 = vmax.f32 %v885_v4, 0.0 }
 0x122   :  { %v933_v31 = vmin.f32 %v901_v52, 10.0  ;;  %v2207_v16 = vpop.eup %2206 }
 0x123   :  { %v1201_v14 = vand.u32 2147483647, %v1169_v60  ;;  %v2933_v60 = vadd.f32 %v1611_v56, %v1581_v26  ;;  %v1171_v56 = vsub.f32 %v1052_v28, %v2855_v22  ;;  %v1326_v35 = vsub.f32 0.0, %v932_v49 }
 0x124   :  { %v2944_v26 = vmul.f32 0.6931472, %v2201_v21  ;;  %v1327_v5 = vsub.f32 0.0, %v933_v31  ;;  %v2209_v21 = vpop.eup %2208  ;;  %v949_v13 = vmin.f32 %v917_v1, 10.0  ;;  %v1430_v31 = vmul.f32 1.442695, %v1389_v44 }
 0x125   :  { %v671_v19 = vpop.f32.mrf.mxu2  ;;  %v1233_v51 = vadd.f32 1e-10, %v1201_v14  ;;  %v2941_v14 = vpop.f32.mrf.mxu1  ;;  %v1203_v11 = vand.u32 2147483647, %v1171_v56  ;;  %v1358_v43 = vmul.f32 %v1326_v35, %v2882_v10 }
 0x126   :  { %v848_v63 = vpop.f32.mrf.mxu3  ;;  %v870_v27 = vadd.f32 1.0, %v671_v19  ;;  %v948_v19 = vmin.f32 %v916_v40, 10.0  ;;  %v1359_v3 = vmul.f32 %v1327_v5, %v2900_v57  ;;  %v1343_v44 = vsub.f32 0.0, %v949_v13 }
 0x127   :  { %2210 = vlog2.f32 %v1233_v51  ;;  %v886_v20 = vadd.f32 1.0, %v848_v63  ;;  %v1373_v63 = vmul.f32 %v1341_v17, %v2890_v61  ;;  %v1390_v56 = vmin.f32 %v1358_v43, 85.0 }
 0x128   :  { %v902_v54 = vmax.f32 %v870_v27, 0.0  ;;  %2212 = vpow2.f32 %v1428_v38  ;;  %v1277_v38 = vmul.f32 0.6931472, %v2207_v16  ;;  %v1342_v49 = vsub.f32 0.0, %v948_v19 }
 0x129   :  { %2214 = vpow2.f32 %v1460_v9  ;;  %v918_v62 = vmax.f32 %v886_v20, 0.0  ;;  %v2957_v9 = vpop.f32.mrf.mxu0 }
 0x12a   :  { %v934_v7 = vmin.f32 %v902_v54, 10.0  ;;  %2216 = vlog2.f32 %v1234_v2  ;;  %v1374_v19 = vmul.f32 %v1342_v49, %v2929_v30 }
 0x12b   :  { %v950_v57 = vmin.f32 %v918_v62, 10.0 }
 0x12c   :  { %v1328_v22 = vsub.f32 0.0, %v934_v7  ;;  %v1235_v7 = vadd.f32 1e-10, %v1203_v11 }
 0x12d   :  { %v673_v58 = vpop.f32.mrf.mxu2  ;;  %v2211_v54 = vpop.eup %2210  ;;  %v1344_v30 = vsub.f32 0.0, %v950_v57 }
 0x12e   :  { %v850_v12 = vpop.f32.mrf.mxu3  ;;  %v871_v27 = vadd.f32 1.0, %v673_v58  ;;  %v2954_v28 = vpop.eup %2212  ;;  %v1360_v4 = vmul.f32 %v1328_v22, %v1277_v38  ;;  %v1279_v35 = vmul.f32 0.6931472, %v2211_v54  ;;  %v1311_v54 = vmul.f32 0.6931472, %v2209_v21 }
 0x12f   :  { %v887_v18 = vadd.f32 1.0, %v850_v12  ;;  %v2959_v61 = vpop.eup %2214  ;;  %v2962_v20 = vpop.f32.mrf.mxu1  ;;  %v1582_v21 = vsel %vm1534_vm8, %v2947_v39, 0.0 }
 0x130   :  { %v1143_v52 = vpop.permute.xlu1 %1142  ;;  %v903_v51 = vmax.f32 %v871_v27, 0.0  ;;  %v2217_v1 = vpop.eup %2216  ;;  %v1391_v27 = vmin.f32 %v1359_v3, 85.0  ;;  %v1406_v3 = vmin.f32 %v1374_v19, 85.0 }
 0x131   :  { %v1186_v42 = vsub.f32 %v1143_v52, %v2906_v29  ;;  %v919_v33 = vmax.f32 %v887_v18, 0.0  ;;  %v1392_v18 = vmin.f32 %v1360_v4, 85.0  ;;  %v1281_v38 = vmul.f32 0.6931472, %v2217_v1 }
 0x132   :  { %v935_v40 = vmin.f32 %v903_v51, 10.0  ;;  %v1405_v51 = vmin.f32 %v1373_v63, 85.0  ;;  %v1434_v13 = vmul.f32 1.442695, %v1391_v27  ;;  %v1464_v57 = vmul.f32 1.442695, %v1406_v3 }
 0x133   :  { %v1218_v10 = vand.u32 2147483647, %v1186_v42  ;;  %v951_v52 = vmin.f32 %v919_v33, 10.0  ;;  %v1432_v42 = vmul.f32 1.442695, %v1390_v56 }
 0x134   :  { %v1329_v58 = vsub.f32 0.0, %v935_v40  ;;  %v1436_v4 = vmul.f32 1.442695, %v1392_v18  ;;  %v1462_v56 = vmul.f32 1.442695, %v1405_v51 }
 0x135   :  { %v1250_v12 = vadd.f32 1e-10, %v1218_v10  ;;  %v676_v2 = vpop.f32.mrf.mxu2  ;;  %v1375_v10 = vmul.f32 %v1343_v44, %v2916_v34  ;;  %v1345_v33 = vsub.f32 0.0, %v951_v52  ;;  %v2977_v34 = vpop.f32.mrf.mxu0 }
 0x136   :  { %v853_v17 = vpop.f32.mrf.mxu3  ;;  %v872_v16 = vadd.f32 1.0, %v676_v2  ;;  %v1361_v22 = vmul.f32 %v1329_v58, %v1279_v35  ;;  %v1376_v58 = vmul.f32 %v1344_v30, %v2944_v26 }
 0x137   :  { %v888_v5 = vadd.f32 1.0, %v853_v17  ;;  %2218 = vlog2.f32 %v1250_v12  ;;  %v2982_v27 = vpop.f32.mrf.mxu1 }
 0x138   :  { %v904_v11 = vmax.f32 %v872_v16, 0.0  ;;  %2220 = vlog2.f32 %v1235_v7  ;;  %v1393_v40 = vmin.f32 %v1361_v22, 85.0  ;;  %v2973_v7 = vmul.f32 %v2938_v15, %v2865_v8 }
 0x139   :  { %v920_v43 = vmax.f32 %v888_v5, 0.0  ;;  %2222 = vpow2.f32 %v1430_v31  ;;  %v1407_v16 = vmin.f32 %v1375_v10, 85.0  ;;  %v1377_v5 = vmul.f32 %v1345_v33, %v1311_v54 }
 0x13a   :  { %v936_v49 = vmin.f32 %v904_v11, 10.0  ;;  %2224 = vpow2.f32 %v1432_v42  ;;  %v1438_v8 = vmul.f32 1.442695, %v1393_v40  ;;  %v1484_v22 = vmul.f32 %v2954_v28, %v2858_v32 }
 0x13b   :  { %v952_v62 = vmin.f32 %v920_v43, 10.0  ;;  %2226 = vpow2.f32 %v1434_v13  ;;  %v1408_v11 = vmin.f32 %v1376_v58, 85.0  ;;  %v1409_v13 = vmin.f32 %v1377_v5, 85.0 }
 0x13c   :  { %v1330_v35 = vsub.f32 0.0, %v936_v49  ;;  %2228 = vpow2.f32 %v1436_v4  ;;  %v1583_v32 = vsel %vm1535_vm9, %v1484_v22, 0.0 }
 0x13d   :  { %v2219_v63 = vpop.eup %2218  ;;  %v678_v31 = vpop.f32.mrf.mxu2  ;;  %v1346_v17 = vsub.f32 0.0, %v952_v62  ;;  %2230 = vpow2.f32 %v1462_v56  ;;  %v1466_v62 = vmul.f32 1.442695, %v1407_v16  ;;  %v1468_v4 = vmul.f32 1.442695, %v1408_v11 }
 0x13e   :  { %v1313_v12 = vmul.f32 0.6931472, %v2219_v63  ;;  %v1362_v2 = vmul.f32 %v1330_v35, %v1281_v38  ;;  %v2221_v19 = vpop.eup %2220  ;;  %v873_v15 = vadd.f32 1.0, %v678_v31  ;;  %v855_v39 = vpop.f32.mrf.mxu3  ;;  %2232 = vpow2.f32 %v1438_v8 }
 0x13f   :  { %v2223_v26 = vpop.eup %2222  ;;  %v889_v42 = vadd.f32 1.0, %v855_v39  ;;  %v1283_v38 = vmul.f32 0.6931472, %v2221_v19  ;;  %2234 = vpow2.f32 %v1464_v57  ;;  %v1613_v31 = vadd.f32 %v2933_v60, %v1582_v21  ;;  %v322_v58 = vpop.f32.mrf.mxu0 }
 0x140   :  { %v1394_v1 = vmin.f32 %v1362_v2, 85.0  ;;  %v1149_v44 = vpop.permute.xlu1 %1148  ;;  %v905_v18 = vmax.f32 %v873_v15, 0.0  ;;  %v1378_v51 = vmul.f32 %v1346_v17, %v1313_v12  ;;  %v2225_v30 = vpop.eup %2224  ;;  %v1485_v3 = vmul.f32 %v2223_v26, %v2869_v24 }
 0x141   :  { %v1187_v52 = vsub.f32 %v1149_v44, %v2906_v29  ;;  %v2227_v40 = vpop.eup %2226  ;;  %v1486_v33 = vmul.f32 %v2225_v30, %v2909_v41  ;;  %v921_v63 = vmax.f32 %v889_v42, 0.0  ;;  %v1470_v2 = vmul.f32 1.442695, %v1409_v13  ;;  %v496_v16 = vpop.f32.mrf.mxu1 }
 0x142   :  { %v1440_v43 = vmul.f32 1.442695, %v1394_v1  ;;  %v937_v54 = vmin.f32 %v905_v18, 10.0  ;;  %v2229_v10 = vpop.eup %2228  ;;  %v1410_v35 = vmin.f32 %v1378_v51, 85.0  ;;  %v1584_v12 = vsel %vm1536_vm10, %v1485_v3, 0.0 }
 0x143   :  { %v1219_v49 = vand.u32 2147483647, %v1187_v52  ;;  %v2231_v56 = vpop.eup %2230  ;;  %v1487_v17 = vmul.f32 %v2227_v40, %v2931_v46  ;;  %v1614_v19 = vadd.f32 %v1613_v31, %v1583_v32  ;;  %v1488_v57 = vmul.f32 %v2229_v10, %v2957_v9 }
 0x144   :  { %2236 = vpow2.f32 %v1440_v43  ;;  %v1331_v29 = vsub.f32 0.0, %v937_v54  ;;  %v2233_v41 = vpop.eup %2232  ;;  %v1585_v8 = vsel %vm1537_vm11, %v1486_v33, 0.0  ;;  %v1472_v15 = vmul.f32 1.442695, %v1410_v35 }
 0x145   :  { %v1251_v28 = vadd.f32 1e-10, %v1219_v49  ;;  %v2235_v21 = vpop.eup %2234  ;;  %v953_v39 = vmin.f32 %v921_v63, 10.0  ;;  %v1598_v46 = vsel %vm1534_vm8, %v2973_v7, 0.0  ;;  %v1500_v9 = vmul.f32 %v2959_v61, %v2877_v23 }
 0x146   :  { %v1363_v24 = vmul.f32 %v1331_v29, %v1283_v38  ;;  %v1615_v1 = vadd.f32 %v1614_v19, %v1584_v12  ;;  %v1501_v26 = vmul.f32 %v2231_v56, %v2918_v6  ;;  %v1586_v22 = vsel %vm1538_vm12, %v1487_v17, 0.0 }
 0x147   :  { %2238 = vlog2.f32 %v1251_v28  ;;  %v1489_v18 = vmul.f32 %v2233_v41, %v2977_v34  ;;  %v1587_v48 = vsel %vm1539_vm13, %v1488_v57, 0.0  ;;  %v1347_v6 = vsub.f32 0.0, %v953_v39 }
 0x148   :  { %2240 = vpow2.f32 %v1466_v62  ;;  %v1395_v60 = vmin.f32 %v1363_v24, 85.0  ;;  %v1616_v11 = vadd.f32 %v1615_v1, %v1585_v8  ;;  %v1599_v43 = vsel %vm1535_vm9, %v1500_v9, 0.0  ;;  %v1649_v9 = vld [vmem:[%s3083_s3] sm:$0x1]  ;;  %s2317_s3 = smov [#allocation2]  }
 0x149   :  { %2242 = vpow2.f32 %v1468_v4  ;;  %v1502_v34 = vmul.f32 %v2235_v21, %v2941_v14  ;;  %v1634_v30 = vadd.f32 %v2935_v45, %v1598_v46  ;;  %v1588_v54 = vsel %vm1540_vm14, %v1489_v18, 0.0  ;;  %v324_v14 = vpop.f32.mrf.mxu0  ;;  %v499_v32 = vpop.f32.mrf.mxu1  ;;  %s1699_s5 = sshll.u32 %s2317_s3, 4  ;;  %s1700_s5 = int_to_ptr.vmem [resolvable:$true] %s1699_s5 }
 0x14a   :  { %v2237_v5 = vpop.eup %2236  ;;  %v1442_v44 = vmul.f32 1.442695, %v1395_v60  ;;  %2244 = vpow2.f32 %v1470_v2  ;;  %v1617_v51 = vadd.f32 %v1616_v11, %v1586_v22  ;;  %v1600_v49 = vsel %vm1536_vm10, %v1501_v26, 0.0 }
 0x14b   :  { %v1490_v7 = vmul.f32 %v2237_v5, %v322_v58  ;;  %v1635_v13 = vadd.f32 %v1634_v30, %v1599_v43  ;;  %v1601_v28 = vsel %vm1537_vm11, %v1502_v34, 0.0 }
 0x14c   :  { %2246 = vpow2.f32 %v1442_v44  ;;  %v1618_v62 = vadd.f32 %v1617_v51, %v1587_v48 }
 0x14d   :  { %v2239_v52 = vpop.eup %2238  ;;  %2248 = vpow2.f32 %v1472_v15  ;;  %v1589_v45 = vsel %vm1541_vm15, %v1490_v7, 0.0  ;;  %v1636_v4 = vadd.f32 %v1635_v13, %v1600_v49 }
 0x14e   :  { %v2241_v23 = vpop.eup %2240  ;;  %v1315_v61 = vmul.f32 0.6931472, %v2239_v52  ;;  %v1619_v10 = vadd.f32 %v1618_v62, %v1588_v54 }
 0x14f   :  { %v2243_v42 = vpop.eup %2242  ;;  %v1503_v0 = vmul.f32 %v2241_v23, %v2962_v20  ;;  %v1637_v24 = vadd.f32 %v1636_v4, %v1601_v28 }
 0x150   :  { %v1379_v38 = vmul.f32 %v1347_v6, %v1315_v61  ;;  %v2245_v3 = vpop.eup %2244  ;;  %v1504_v25 = vmul.f32 %v2243_v42, %v2982_v27  ;;  %v1620_v31 = vadd.f32 %v1619_v10, %v1589_v45 }
 0x151   :  { %v1602_v63 = vsel %vm1538_vm12, %v1503_v0, 0.0  ;;  %v1505_v56 = vmul.f32 %v2245_v3, %v496_v16  ;;  %v501_v8 = vpop.f32.mrf.mxu1 }
 0x152   :  { %v1411_v40 = vmin.f32 %v1379_v38, 85.0  ;;  %v2247_v29 = vpop.eup %2246  ;;  %v1603_v27 = vsel %vm1539_vm13, %v1504_v25, 0.0  ;;  %v1638_v2 = vadd.f32 %v1637_v24, %v1602_v63 }
 0x153   :  { %v2249_v20 = vpop.eup %2248  ;;  %v1491_v35 = vmul.f32 %v2247_v29, %v324_v14  ;;  %v1604_v37 = vsel %vm1540_vm14, %v1505_v56, 0.0 }
 0x154   :  { %v1474_v33 = vmul.f32 1.442695, %v1411_v40  ;;  %v1506_v58 = vmul.f32 %v2249_v20, %v499_v32  ;;  %v1639_v41 = vadd.f32 %v1638_v2, %v1603_v27 }
 0x155   :  { %v1590_v36 = vsel %vm1542_vm0, %v1491_v35, 0.0 }
 0x156   :  { %2250 = vpow2.f32 %v1474_v33  ;;  %v1621_v12 = vadd.f32 %v1620_v31, %v1590_v36  ;;  %v1605_v19 = vsel %vm1541_vm15, %v1506_v58, 0.0  ;;  %v1640_v21 = vadd.f32 %v1639_v41, %v1604_v37 }
 0x158   :  { %v1622_v17 = vrot.slane %v1621_v12, 4  ;;  %v1641_v39 = vadd.f32 %v1640_v21, %v1605_v19 }
 0x15a   :  { %v1623_v57 = vadd.f32 %v1622_v17, %v1621_v12 }
 0x15c   :  { %v2251_v60 = vpop.eup %2250  ;;  %v1624_v15 = vrot.slane %v1623_v57, 2 }
 0x15d   :  { %v1507_v47 = vmul.f32 %v2251_v60, %v501_v8 }
 0x15e   :  { %v1625_v16 = vadd.f32 %v1624_v15, %v1623_v57 }
 0x15f   :  { %v1606_v5 = vsel %vm1542_vm0, %v1507_v47, 0.0 }
 0x160   :  { %v1642_v55 = vadd.f32 %v1641_v39, %v1606_v5  ;;  %v1626_v46 = vrot.slane %v1625_v16, 1 }
 0x162   :  { %v1643_v50 = vrot.slane %v1642_v55, 4  ;;  %v1627_v1 = vadd.f32 %v1626_v46, %v1625_v16 }
 0x164   :  { %v1644_v44 = vadd.f32 %v1643_v50, %v1642_v55  ;;  %v1651_v26 = vadd.f32 %v1649_v9, %v1627_v1 }
 0x166   :  { %v1645_v22 = vrot.slane %v1644_v44, 2  ;;  %v2019_v18 = vmul.f32 -1.442695, %v1651_v26  ;;  %1653 = vst [vmem:[#allocation4] sm:$0x1] %v1651_v26 }
 0x168   :  { %v1646_v52 = vadd.f32 %v1645_v22, %v1644_v44  ;;  %2252 = vpow2.f32 %v2019_v18 }
 0x16a   :  { %v1647_v11 = vrot.slane %v1646_v52, 1 }
 0x16c   :  { %v1648_v53 = vadd.f32 %v1647_v11, %v1646_v52 }
 0x16e   :  { %v1652_v48 = vadd.f32 %v1650_v59, %v1648_v53  ;;  %v2253_v23 = vpop.eup %2252 }
 0x16f   :  { %v1661_v6 = vadd.f32 1.0, %v2253_v23 }
 0x170   :  { %v2020_v61 = vmul.f32 -1.442695, %v1652_v48  ;;  %1654 = vst [vmem:[#allocation4 + $0x1] sm:$0x1] %v1652_v48 }
 0x171   :  { %1720 = dma.vmem_to_hbm [thread:$0]  %s1713_s29, 32, %s1715_s7, [#allocation5], %s2315_s8, %s2315_s8, %s2316_s9   ;;  %2254 = vrcp.f32 %v1661_v6  ;;  %v1674_v30 = vand.u32 2147483648, %v1661_v6  ;;  %v1672_v54 = vand.u32 2147483647, %v1661_v6  ;;  %vm1668_vm2 = vweird.f32 %v1661_v6 }
 0x172   :  { %2256 = vpow2.f32 %v2020_v61 }
 0x173   :  { %v1675_v0 = vor.u32 1.1754944e-38, %v1674_v30  ;;  %vm1673_vm4 = vcmp.eq.f32.partialorder %v1672_v54, 8.507059e+37 }
 0x177   :  { %v2255_v7 = vpop.eup %2254 }
 0x178   :  { %v2257_v43 = vpop.eup %2256  ;;  %v1664_v34 = vmul.f32 %v2255_v7, %v1661_v6  ;;  %vm1669_vm1 = vweird.f32 %v2255_v7 }
 0x179   :  { %v1662_v51 = vadd.f32 1.0, %v2257_v43  ;;  %vm1670_vm3 = vmor %vm1668_vm2, %vm1669_vm1 }
 0x17a   :  { %v1665_v42 = vsub.f32 1.0, %v1664_v34 }
 0x17b   :  { %2258 = vrcp.f32 %v1662_v51  ;;  %v1689_v45 = vand.u32 2147483648, %v1662_v51  ;;  %v1687_v29 = vand.u32 2147483647, %v1662_v51  ;;  %vm1683_vm6 = vweird.f32 %v1662_v51 }
 0x17c   :  { %v1666_v38 = vmul.f32 %v2255_v7, %v1665_v42 }
 0x17d   :  { %v1690_v25 = vor.u32 1.1754944e-38, %v1689_v45  ;;  %vm1688_vm8 = vcmp.eq.f32.partialorder %v1687_v29, 8.507059e+37 }
 0x17e   :  { %v1667_v49 = vadd.f32 %v2255_v7, %v1666_v38 }
 0x180   :  { %v1671_v62 = vsel %vm1670_vm3, %v2255_v7, %v1667_v49 }
 0x181   :  { %v2259_v14 = vpop.eup %2258  ;;  %v1676_v3 = vsel %vm1673_vm4, %v1675_v0, %v1671_v62 }
 0x182   :  { %v1679_v13 = vmul.f32 %v2259_v14, %v1662_v51  ;;  %1693 = vst [vmem:[#allocation2] sm:$0x1] %v1676_v3  ;;  %vm1684_vm5 = vweird.f32 %v2259_v14 }
 0x183   :  { %vm1685_vm7 = vmor %vm1683_vm6, %vm1684_vm5 }
 0x184   :  { %v1680_v40 = vsub.f32 1.0, %v1679_v13 }
 0x186   :  { %v1681_v32 = vmul.f32 %v2259_v14, %v1680_v40 }
 0x188   :  { %v1682_v28 = vadd.f32 %v2259_v14, %v1681_v32 }
 0x18a   :  { %v1686_v10 = vsel %vm1685_vm7, %v2259_v14, %v1682_v28 }
 0x18b   :  { %v1691_v20 = vsel %vm1688_vm8, %v1690_v25, %v1686_v10 }
 0x18c   :  { %1694 = vst [vmem:[#allocation2 + $0x1] sm:$0x1] %v1691_v20 }
 0x18d   :  { %1707 = dma.vmem_to_hbm [thread:$0]  %s1700_s5, 32, %s1702_s12, [#allocation3], %s2315_s8, %s2315_s8, %s2316_s9  }
 0x18e   :  { %2310 = dma.done.wait [#allocation3], 32  }
 0x18f   :  { %2311 = vsyncadd [#allocation3], 4294967264 }
 0x190   :  { %2312 = dma.done.wait [#allocation5], 32  }
 0x191   :  { %2313 = vsyncadd [#allocation5], 4294967264 }
 0x192   :  { %1729 = vsyncpa [#allocation3], 1 }
 0x193   :  { %1730 = vsyncpa [#allocation5], 1 }

</bundles_post_ra>
